<compile_context>
chip_gen: v7x
topology: tpu7x:2x2x1
jax: 0.10.0
libtpu: 0.0.40
codegen_flags: <defaults>
</compile_context>

<pallas_src>
import functools
import math

import jax
import jax.numpy as jnp
from jax import lax
from jax.experimental import pallas as pl
from jax.experimental.pallas import tpu as pltpu  # noqa: F401


# ---------------------------------------------------------------------------
# Fused whole-layer kernel
# ---------------------------------------------------------------------------
def _make_attn_layer_kernel(B, nhead, d_model, eps=1e-5):
    D = d_model
    H = nhead
    Dh = D // H
    scale = 1.0 / math.sqrt(Dh)
    NEG = -1e30  # additive mask for cross-batch score entries

    # Row-parameter stack layout (rowp, shape (21, D)):
    #   0..3   self-attn  bq, bk, bv, bo
    #   4..7   cross0     bq, bk, bv, bo
    #   8..11  cross1     bq, bk, bv, bo
    #   12,13  norm1  gamma, beta
    #   14,15  norm2a gamma, beta
    #   16,17  norm2b gamma, beta
    #   18,19  norm3  gamma, beta
    #   20     linear2 bias
    # Weight stack layout (w_dd, shape (12, D, D)): same 0..11 order (q,k,v,o).

    def kernel(tgt_ref, pos_ref, mem0_ref, mpos0_ref, mem1_ref, mpos1_ref,
               w_dd_ref, rowp_ref, w_ff1_ref, b_ff1_ref, w_ff2_ref,
               out_ref):
        RP = rowp_ref[...]                      # (21, D) — loaded once

        def rp(i):
            return RP[i:i + 1, :]               # (1, D) row view

        def proj(x, wi, bi):
            return (jnp.dot(x, w_dd_ref[wi],
                            preferred_element_type=jnp.float32) + rp(bi))

        def mha(xq, xk, xv, base):
            """Multi-head attention on batch-flattened rows.

            xq: (Rq, D) with Rq = B*L, xk/xv: (Rk, D) with Rk = B*S.
            Rows are seq-major flattened, so a row's batch index is row % B;
            cross-batch score entries are masked to NEG before softmax, which
            makes the single flattened PV matmul exactly the per-batch result.
            """
            Rq = xq.shape[0]
            Rk = xk.shape[0]
            q = proj(xq, base + 0, base + 0)    # (Rq, D)
            k = proj(xk, base + 1, base + 1)    # (Rk, D)
            v = proj(xv, base + 2, base + 2)    # (Rk, D)

            # Per-head scores (q @ k^T without materializing a transpose),
            # row-stacked so the softmax runs once on (H*Rq, Rk).
            s_list = []
            for h in range(H):
                lo = h * Dh
                s_list.append(
                    lax.dot_general(q[:, lo:lo + Dh], k[:, lo:lo + Dh],
                                    (((1,), (1,)), ((), ())),
                                    preferred_element_type=jnp.float32))
            s = jnp.concatenate(s_list, axis=0) * scale      # (H*Rq, Rk)

            # Cross-batch mask: H*Rq is a multiple of B, so (stacked row) % B
            # is still that query row's batch index.
            ri = lax.broadcasted_iota(jnp.int32, (H * Rq, Rk), 0)
            cj = lax.broadcasted_iota(jnp.int32, (H * Rq, Rk), 1)
            s = jnp.where((ri % B) == (cj % B), s, NEG)

            s = s - jnp.max(s, axis=-1, keepdims=True)
            p = jnp.exp(s)
            p = p / jnp.sum(p, axis=-1, keepdims=True)       # exact division

            # Per-head PV, then concat heads along lanes -> one Wo matmul.
            o_list = []
            for h in range(H):
                lo = h * Dh
                o_list.append(jnp.dot(p[h * Rq:(h + 1) * Rq, :],
                                      v[:, lo:lo + Dh],
                                      preferred_element_type=jnp.float32))
            o = jnp.concatenate(o_list, axis=-1)             # (Rq, D)
            return (jnp.dot(o, w_dd_ref[base + 3],
                            preferred_element_type=jnp.float32) + rp(base + 3))

        def add_ln(x, y, gi):
            z = x + y
            mu = jnp.mean(z, axis=-1, keepdims=True)
            var = jnp.mean(jnp.square(z - mu), axis=-1, keepdims=True)
            return (z - mu) * lax.rsqrt(var + eps) * rp(gi) + rp(gi + 1)

        tgt = tgt_ref[...]                      # (B*L, D)
        pos = pos_ref[...]                      # (B*L, D)

        # ---- self attention (query == key input) ----
        xqk = tgt + pos
        t = add_ln(tgt, mha(xqk, xqk, tgt, 0), 12)

        # ---- cross attention block 0 ----
        m0 = mem0_ref[...]                      # (B*S0, D)
        t = add_ln(t, mha(t + pos, m0 + mpos0_ref[...], m0, 4), 14)

        # ---- cross attention block 1 ----
        m1 = mem1_ref[...]                      # (B*S1, D)
        t = add_ln(t, mha(t + pos, m1 + mpos1_ref[...], m1, 8), 16)

        # ---- feed-forward: linear2(relu(linear1(t))) ----
        hmid = jnp.maximum(
            jnp.dot(t, w_ff1_ref[...], preferred_element_type=jnp.float32)
            + b_ff1_ref[...], 0.0)
        t2 = (jnp.dot(hmid, w_ff2_ref[...],
                      preferred_element_type=jnp.float32) + rp(20))
        out_ref[...] = add_ln(t, t2, 18).astype(out_ref.dtype)

    return kernel


# ---------------------------------------------------------------------------
# Host wrapper (attnLayer.forward_post semantics)
# ---------------------------------------------------------------------------
def attn_layer_forward(packed, tgt, memory_list, pos=None, memory_pos=None,
                       nhead=4):
    """attnLayer.forward_post (normalize_before=False), eval mode.

    `packed` comes from `pack_params` (one-time parameter prep, outside jit).
    Sequence-first (L, B, D) API is kept; the only layout ops in the jitted
    path are free row-major reshapes (L, B, D) <-> (L*B, D).
    """
    L, B, D = tgt.shape
    assert D % nhead == 0
    assert len(memory_list) == 2
    mem0, mem1 = memory_list

    if pos is None:
        pos = jnp.zeros_like(tgt)
    if memory_pos is None:
        memory_pos = [None, None]
    mpos0 = jnp.zeros_like(mem0) if memory_pos[0] is None else memory_pos[0]
    mpos1 = jnp.zeros_like(mem1) if memory_pos[1] is None else memory_pos[1]

    flat = lambda x: x.reshape(x.shape[0] * x.shape[1], x.shape[2])

    kernel = _make_attn_layer_kernel(B, nhead, D)
    out = pl.pallas_call(
        kernel,
        out_shape=jax.ShapeDtypeStruct((L * B, D), tgt.dtype),
    )(
        flat(tgt), flat(pos), flat(mem0), flat(mpos0), flat(mem1), flat(mpos1),
        packed["w_dd"], packed["rowp"],
        packed["w_ff1"], packed["b_ff1"], packed["w_ff2"],
    )
    return out.reshape(L, B, D)


# ---------------------------------------------------------------------------
# Parameter construction & one-time packing (outside the jitted forward)
# ---------------------------------------------------------------------------
def make_mha_params(key, d):
    ks = jax.random.split(key, 4)
    scale = 0.02
    return {
        "wq": scale * jax.random.normal(ks[0], (d, d), jnp.float32),
        "wk": scale * jax.random.normal(ks[1], (d, d), jnp.float32),
        "wv": scale * jax.random.normal(ks[2], (d, d), jnp.float32),
        "wo": scale * jax.random.normal(ks[3], (d, d), jnp.float32),
        "bq": jnp.zeros((1, d), jnp.float32),
        "bk": jnp.zeros((1, d), jnp.float32),
        "bv": jnp.zeros((1, d), jnp.float32),
        "bo": jnp.zeros((1, d), jnp.float32),
    }


def make_params(key, d_model, dim_feedforward):
    ks = jax.random.split(key, 6)
    ln = lambda: {"g": jnp.ones((1, d_model), jnp.float32),
                  "b": jnp.zeros((1, d_model), jnp.float32)}
    return {
        "self_attn": make_mha_params(ks[0], d_model),
        "cross_attn": [make_mha_params(ks[1], d_model),
                       make_mha_params(ks[2], d_model)],
        "norm1": ln(),
        "norm2": [ln(), ln()],
        "norm3": ln(),
        "linear1_w": 0.02 * jax.random.normal(ks[3], (d_model, dim_feedforward),
                                              jnp.float32),
        "linear1_b": jnp.zeros((1, dim_feedforward), jnp.float32),
        "linear2_w": 0.02 * jax.random.normal(ks[4], (dim_feedforward, d_model),
                                              jnp.float32),
        "linear2_b": jnp.zeros((1, d_model), jnp.float32),
    }


def pack_params(params):
    """One-time consolidation of the ~38 small tensors into 5 kernel operands.

    Weights use the (Din, Dout) convention (PyTorch weights pre-transposed);
    biases / LayerNorm params are (1, D) rows.
    """
    sa = params["self_attn"]
    c0, c1 = params["cross_attn"]
    n2a, n2b = params["norm2"]

    w_dd = jnp.stack(
        [sa["wq"], sa["wk"], sa["wv"], sa["wo"],
         c0["wq"], c0["wk"], c0["wv"], c0["wo"],
         c1["wq"], c1["wk"], c1["wv"], c1["wo"]], axis=0)        # (12, D, D)

    rowp = jnp.concatenate(
        [sa["bq"], sa["bk"], sa["bv"], sa["bo"],
         c0["bq"], c0["bk"], c0["bv"], c0["bo"],
         c1["bq"], c1["bk"], c1["bv"], c1["bo"],
         params["norm1"]["g"], params["norm1"]["b"],
         n2a["g"], n2a["b"], n2b["g"], n2b["b"],
         params["norm3"]["g"], params["norm3"]["b"],
         params["linear2_b"]], axis=0)                           # (21, D)

    return {
        "w_dd": w_dd,
        "rowp": rowp,
        "w_ff1": params["linear1_w"],       # (D, dff)
        "b_ff1": params["linear1_b"],       # (1, dff)
        "w_ff2": params["linear2_w"],       # (dff, D)
    }


# ---------------------------------------------------------------------------
if __name__ == "__main__":
    d_model, nhead, dim_feedforward = 32, 4, 64
    L, B = 8, 2          # target sequence length, batch
    S0, S1 = 8, 12       # the two memory sequence lengths

    root = jax.random.PRNGKey(0)
    k_par, k_tgt, k_m0, k_m1, k_pos, k_mp0, k_mp1 = jax.random.split(root, 7)

    params = make_params(k_par, d_model, dim_feedforward)
    packed = pack_params(params)     # one-time prep, outside the jitted path

    tgt = jax.random.normal(k_tgt, (L, B, d_model), jnp.float32)
    memory_list = [jax.random.normal(k_m0, (S0, B, d_model), jnp.float32),
                   jax.random.normal(k_m1, (S1, B, d_model), jnp.float32)]
    pos = jax.random.normal(k_pos, (L, B, d_model), jnp.float32)
    memory_pos = [jax.random.normal(k_mp0, (S0, B, d_model), jnp.float32),
                  jax.random.normal(k_mp1, (S1, B, d_model), jnp.float32)]

    forward = jax.jit(functools.partial(attn_layer_forward, nhead=nhead))
    out = forward(packed, tgt, memory_list, pos=pos, memory_pos=memory_pos)
    out = jax.block_until_ready(out)

    assert out.shape == (L, B, d_model)
    assert bool(jnp.all(jnp.isfinite(out)))
    print("KERNEL_OK")
</pallas_src>

<mosaic_0001>
module attributes {stable_mosaic.version = 11 : i64} {
  func.func @kernel(%arg0: memref<16x32xf32, #tpu.memory_space<vmem>>, %arg1: memref<16x32xf32, #tpu.memory_space<vmem>>, %arg2: memref<16x32xf32, #tpu.memory_space<vmem>>, %arg3: memref<16x32xf32, #tpu.memory_space<vmem>>, %arg4: memref<24x32xf32, #tpu.memory_space<vmem>>, %arg5: memref<24x32xf32, #tpu.memory_space<vmem>>, %arg6: memref<12x32x32xf32, #tpu.memory_space<vmem>>, %arg7: memref<21x32xf32, #tpu.memory_space<vmem>>, %arg8: memref<32x64xf32, #tpu.memory_space<vmem>>, %arg9: memref<1x64xf32, #tpu.memory_space<vmem>>, %arg10: memref<64x32xf32, #tpu.memory_space<vmem>>, %arg11: memref<16x32xf32, #tpu.memory_space<vmem>>) attributes {dimension_semantics = [], scalar_prefetch = 0 : i64, scratch_operands = 0 : i64, tpu.core_type = #tpu.core_type<tc>} {
    %c0 = arith.constant 0 : index
    %c0_0 = arith.constant 0 : index
    %0 = vector.load %arg7[%c0, %c0_0] : memref<21x32xf32, #tpu.memory_space<vmem>>, vector<21x32xf32>
    %c0_1 = arith.constant 0 : index
    %c0_2 = arith.constant 0 : index
    %1 = vector.load %arg0[%c0_1, %c0_2] : memref<16x32xf32, #tpu.memory_space<vmem>>, vector<16x32xf32>
    %c0_3 = arith.constant 0 : index
    %c0_4 = arith.constant 0 : index
    %2 = vector.load %arg1[%c0_3, %c0_4] : memref<16x32xf32, #tpu.memory_space<vmem>>, vector<16x32xf32>
    %3 = arith.addf %1, %2 : vector<16x32xf32>
    %c0_5 = arith.constant 0 : index
    %c0_6 = arith.constant 0 : index
    %c0_7 = arith.constant 0 : index
    %4 = vector.load %arg6[%c0_5, %c0_6, %c0_7] : memref<12x32x32xf32, #tpu.memory_space<vmem>>, vector<1x32x32xf32>
    %5 = vector.shape_cast %4 : vector<1x32x32xf32> to vector<32x32xf32>
    %cst = arith.constant dense<0.000000e+00> : vector<16x32xf32>
    %6 = tpu.matmul %3, %5, %cst {dimension_numbers = #tpu.dot_dimension_numbers<[1], [0], [0], [1], [0, 0, 1, 1], [], []>} : vector<16x32xf32>, vector<32x32xf32>, vector<16x32xf32> -> vector<16x32xf32>
    %7 = vector.extract_strided_slice %0 {offsets = [0, 0], sizes = [1, 32], strides = [1, 1]} : vector<21x32xf32> to vector<1x32xf32>
    %8 = vector.broadcast %7 : vector<1x32xf32> to vector<16x32xf32>
    %9 = arith.addf %6, %8 : vector<16x32xf32>
    %c1 = arith.constant 1 : index
    %c0_8 = arith.constant 0 : index
    %c0_9 = arith.constant 0 : index
    %10 = vector.load %arg6[%c1, %c0_8, %c0_9] : memref<12x32x32xf32, #tpu.memory_space<vmem>>, vector<1x32x32xf32>
    %11 = vector.shape_cast %10 : vector<1x32x32xf32> to vector<32x32xf32>
    %cst_10 = arith.constant dense<0.000000e+00> : vector<16x32xf32>
    %12 = tpu.matmul %3, %11, %cst_10 {dimension_numbers = #tpu.dot_dimension_numbers<[1], [0], [0], [1], [0, 0, 1, 1], [], []>} : vector<16x32xf32>, vector<32x32xf32>, vector<16x32xf32> -> vector<16x32xf32>
    %13 = vector.extract_strided_slice %0 {offsets = [1, 0], sizes = [1, 32], strides = [1, 1]} : vector<21x32xf32> to vector<1x32xf32>
    %14 = vector.broadcast %13 : vector<1x32xf32> to vector<16x32xf32>
    %15 = arith.addf %12, %14 : vector<16x32xf32>
    %c2 = arith.constant 2 : index
    %c0_11 = arith.constant 0 : index
    %c0_12 = arith.constant 0 : index
    %16 = vector.load %arg6[%c2, %c0_11, %c0_12] : memref<12x32x32xf32, #tpu.memory_space<vmem>>, vector<1x32x32xf32>
    %17 = vector.shape_cast %16 : vector<1x32x32xf32> to vector<32x32xf32>
    %cst_13 = arith.constant dense<0.000000e+00> : vector<16x32xf32>
    %18 = tpu.matmul %1, %17, %cst_13 {dimension_numbers = #tpu.dot_dimension_numbers<[1], [0], [0], [1], [0, 0, 1, 1], [], []>} : vector<16x32xf32>, vector<32x32xf32>, vector<16x32xf32> -> vector<16x32xf32>
    %19 = vector.extract_strided_slice %0 {offsets = [2, 0], sizes = [1, 32], strides = [1, 1]} : vector<21x32xf32> to vector<1x32xf32>
    %20 = vector.broadcast %19 : vector<1x32xf32> to vector<16x32xf32>
    %21 = arith.addf %18, %20 : vector<16x32xf32>
    %22 = vector.extract_strided_slice %9 {offsets = [0, 0], sizes = [16, 8], strides = [1, 1]} : vector<16x32xf32> to vector<16x8xf32>
    %23 = vector.extract_strided_slice %15 {offsets = [0, 0], sizes = [16, 8], strides = [1, 1]} : vector<16x32xf32> to vector<16x8xf32>
    %cst_14 = arith.constant dense<0.000000e+00> : vector<16x16xf32>
    %24 = tpu.matmul %22, %23, %cst_14 {dimension_numbers = #tpu.dot_dimension_numbers<[1], [1], [0], [0], [0, 0, 1, 0], [], []>} : vector<16x8xf32>, vector<16x8xf32>, vector<16x16xf32> -> vector<16x16xf32>
    %25 = vector.extract_strided_slice %9 {offsets = [0, 8], sizes = [16, 8], strides = [1, 1]} : vector<16x32xf32> to vector<16x8xf32>
    %26 = vector.extract_strided_slice %15 {offsets = [0, 8], sizes = [16, 8], strides = [1, 1]} : vector<16x32xf32> to vector<16x8xf32>
    %cst_15 = arith.constant dense<0.000000e+00> : vector<16x16xf32>
    %27 = tpu.matmul %25, %26, %cst_15 {dimension_numbers = #tpu.dot_dimension_numbers<[1], [1], [0], [0], [0, 0, 1, 0], [], []>} : vector<16x8xf32>, vector<16x8xf32>, vector<16x16xf32> -> vector<16x16xf32>
    %28 = vector.extract_strided_slice %9 {offsets = [0, 16], sizes = [16, 8], strides = [1, 1]} : vector<16x32xf32> to vector<16x8xf32>
    %29 = vector.extract_strided_slice %15 {offsets = [0, 16], sizes = [16, 8], strides = [1, 1]} : vector<16x32xf32> to vector<16x8xf32>
    %cst_16 = arith.constant dense<0.000000e+00> : vector<16x16xf32>
    %30 = tpu.matmul %28, %29, %cst_16 {dimension_numbers = #tpu.dot_dimension_numbers<[1], [1], [0], [0], [0, 0, 1, 0], [], []>} : vector<16x8xf32>, vector<16x8xf32>, vector<16x16xf32> -> vector<16x16xf32>
    %31 = vector.extract_strided_slice %9 {offsets = [0, 24], sizes = [16, 8], strides = [1, 1]} : vector<16x32xf32> to vector<16x8xf32>
    %32 = vector.extract_strided_slice %15 {offsets = [0, 24], sizes = [16, 8], strides = [1, 1]} : vector<16x32xf32> to vector<16x8xf32>
    %cst_17 = arith.constant dense<0.000000e+00> : vector<16x16xf32>
    %33 = tpu.matmul %31, %32, %cst_17 {dimension_numbers = #tpu.dot_dimension_numbers<[1], [1], [0], [0], [0, 0, 1, 0], [], []>} : vector<16x8xf32>, vector<16x8xf32>, vector<16x16xf32> -> vector<16x16xf32>
    %34 = tpu.concatenate %24, %27, %30, %33 in 0 : vector<16x16xf32>, vector<16x16xf32>, vector<16x16xf32>, vector<16x16xf32> -> vector<64x16xf32>
    %cst_18 = arith.constant 0.353553385 : f32
    %35 = vector.broadcast %cst_18 : f32 to vector<64x16xf32>
    %36 = arith.mulf %34, %35 : vector<64x16xf32>
    %37 = tpu.iota {dimensions = array<i32: 0>} : vector<64x16xi32>
    %38 = tpu.iota {dimensions = array<i32: 1>} : vector<64x16xi32>
    %c2_i32 = arith.constant 2 : i32
    %c0_i32 = arith.constant 0 : i32
    %39 = arith.cmpi eq, %c2_i32, %c0_i32 : i32
    %c1_i32 = arith.constant 1 : i32
    %40 = arith.select %39, %c1_i32, %c2_i32 : i32
    %41 = vector.broadcast %40 : i32 to vector<64x16xi32>
    %42 = arith.remsi %37, %41 : vector<64x16xi32>
    %c0_i32_19 = arith.constant 0 : i32
    %43 = vector.broadcast %c0_i32_19 : i32 to vector<64x16xi32>
    %44 = arith.cmpi ne, %42, %43 : vector<64x16xi32>
    %c0_i32_20 = arith.constant 0 : i32
    %45 = vector.broadcast %c0_i32_20 : i32 to vector<64x16xi32>
    %46 = arith.cmpi slt, %42, %45 : vector<64x16xi32>
    %c0_i32_21 = arith.constant 0 : i32
    %47 = arith.cmpi slt, %40, %c0_i32_21 : i32
    %48 = vector.broadcast %47 : i1 to vector<64x16xi1>
    %49 = vector.broadcast %48 : vector<64x16xi1> to vector<64x16xi1>
    %50 = arith.xori %46, %49 : vector<64x16xi1>
    %51 = arith.andi %50, %44 : vector<64x16xi1>
    %52 = vector.broadcast %40 : i32 to vector<64x16xi32>
    %53 = arith.addi %42, %52 : vector<64x16xi32>
    %54 = arith.select %51, %53, %42 : vector<64x16xi1>, vector<64x16xi32>
    %c2_i32_22 = arith.constant 2 : i32
    %c0_i32_23 = arith.constant 0 : i32
    %55 = arith.cmpi eq, %c2_i32_22, %c0_i32_23 : i32
    %c1_i32_24 = arith.constant 1 : i32
    %56 = arith.select %55, %c1_i32_24, %c2_i32_22 : i32
    %57 = vector.broadcast %56 : i32 to vector<64x16xi32>
    %58 = arith.remsi %38, %57 : vector<64x16xi32>
    %c0_i32_25 = arith.constant 0 : i32
    %59 = vector.broadcast %c0_i32_25 : i32 to vector<64x16xi32>
    %60 = arith.cmpi ne, %58, %59 : vector<64x16xi32>
    %c0_i32_26 = arith.constant 0 : i32
    %61 = vector.broadcast %c0_i32_26 : i32 to vector<64x16xi32>
    %62 = arith.cmpi slt, %58, %61 : vector<64x16xi32>
    %c0_i32_27 = arith.constant 0 : i32
    %63 = arith.cmpi slt, %56, %c0_i32_27 : i32
    %64 = vector.broadcast %63 : i1 to vector<64x16xi1>
    %65 = vector.broadcast %64 : vector<64x16xi1> to vector<64x16xi1>
    %66 = arith.xori %62, %65 : vector<64x16xi1>
    %67 = arith.andi %66, %60 : vector<64x16xi1>
    %68 = vector.broadcast %56 : i32 to vector<64x16xi32>
    %69 = arith.addi %58, %68 : vector<64x16xi32>
    %70 = arith.select %67, %69, %58 : vector<64x16xi1>, vector<64x16xi32>
    %71 = arith.cmpi eq, %54, %70 : vector<64x16xi32>
    %cst_28 = arith.constant -1.000000e+30 : f32
    %72 = vector.broadcast %cst_28 : f32 to vector<64x16xf32>
    %73 = arith.select %71, %36, %72 : vector<64x16xi1>, vector<64x16xf32>
    %cst_29 = arith.constant dense<0xFF800000> : vector<64xf32>
    %74 = vector.multi_reduction <maximumf>, %73, %cst_29 [1] : vector<64x16xf32> to vector<64xf32>
    %75 = vector.shape_cast %74 : vector<64xf32> to vector<64x1xf32>
    %76 = vector.broadcast %75 : vector<64x1xf32> to vector<64x16xf32>
    %77 = arith.subf %73, %76 : vector<64x16xf32>
    %78 = math.exp %77 : vector<64x16xf32>
    %cst_30 = arith.constant dense<0.000000e+00> : vector<64xf32>
    %79 = vector.multi_reduction <add>, %78, %cst_30 [1] : vector<64x16xf32> to vector<64xf32>
    %80 = vector.shape_cast %79 : vector<64xf32> to vector<64x1xf32>
    %81 = vector.broadcast %80 : vector<64x1xf32> to vector<64x16xf32>
    %82 = arith.divf %78, %81 : vector<64x16xf32>
    %83 = vector.extract_strided_slice %82 {offsets = [0, 0], sizes = [16, 16], strides = [1, 1]} : vector<64x16xf32> to vector<16x16xf32>
    %84 = vector.extract_strided_slice %21 {offsets = [0, 0], sizes = [16, 8], strides = [1, 1]} : vector<16x32xf32> to vector<16x8xf32>
    %cst_31 = arith.constant dense<0.000000e+00> : vector<16x8xf32>
    %85 = tpu.matmul %83, %84, %cst_31 {dimension_numbers = #tpu.dot_dimension_numbers<[1], [0], [0], [1], [0, 0, 1, 1], [], []>} : vector<16x16xf32>, vector<16x8xf32>, vector<16x8xf32> -> vector<16x8xf32>
    %86 = vector.extract_strided_slice %82 {offsets = [16, 0], sizes = [16, 16], strides = [1, 1]} : vector<64x16xf32> to vector<16x16xf32>
    %87 = vector.extract_strided_slice %21 {offsets = [0, 8], sizes = [16, 8], strides = [1, 1]} : vector<16x32xf32> to vector<16x8xf32>
    %cst_32 = arith.constant dense<0.000000e+00> : vector<16x8xf32>
    %88 = tpu.matmul %86, %87, %cst_32 {dimension_numbers = #tpu.dot_dimension_numbers<[1], [0], [0], [1], [0, 0, 1, 1], [], []>} : vector<16x16xf32>, vector<16x8xf32>, vector<16x8xf32> -> vector<16x8xf32>
    %89 = vector.extract_strided_slice %82 {offsets = [32, 0], sizes = [16, 16], strides = [1, 1]} : vector<64x16xf32> to vector<16x16xf32>
    %90 = vector.extract_strided_slice %21 {offsets = [0, 16], sizes = [16, 8], strides = [1, 1]} : vector<16x32xf32> to vector<16x8xf32>
    %cst_33 = arith.constant dense<0.000000e+00> : vector<16x8xf32>
    %91 = tpu.matmul %89, %90, %cst_33 {dimension_numbers = #tpu.dot_dimension_numbers<[1], [0], [0], [1], [0, 0, 1, 1], [], []>} : vector<16x16xf32>, vector<16x8xf32>, vector<16x8xf32> -> vector<16x8xf32>
    %92 = vector.extract_strided_slice %82 {offsets = [48, 0], sizes = [16, 16], strides = [1, 1]} : vector<64x16xf32> to vector<16x16xf32>
    %93 = vector.extract_strided_slice %21 {offsets = [0, 24], sizes = [16, 8], strides = [1, 1]} : vector<16x32xf32> to vector<16x8xf32>
    %cst_34 = arith.constant dense<0.000000e+00> : vector<16x8xf32>
    %94 = tpu.matmul %92, %93, %cst_34 {dimension_numbers = #tpu.dot_dimension_numbers<[1], [0], [0], [1], [0, 0, 1, 1], [], []>} : vector<16x16xf32>, vector<16x8xf32>, vector<16x8xf32> -> vector<16x8xf32>
    %95 = tpu.concatenate %85, %88, %91, %94 in 1 : vector<16x8xf32>, vector<16x8xf32>, vector<16x8xf32>, vector<16x8xf32> -> vector<16x32xf32>
    %c3 = arith.constant 3 : index
    %c0_35 = arith.constant 0 : index
    %c0_36 = arith.constant 0 : index
    %96 = vector.load %arg6[%c3, %c0_35, %c0_36] : memref<12x32x32xf32, #tpu.memory_space<vmem>>, vector<1x32x32xf32>
    %97 = vector.shape_cast %96 : vector<1x32x32xf32> to vector<32x32xf32>
    %cst_37 = arith.constant dense<0.000000e+00> : vector<16x32xf32>
    %98 = tpu.matmul %95, %97, %cst_37 {dimension_numbers = #tpu.dot_dimension_numbers<[1], [0], [0], [1], [0, 0, 1, 1], [], []>} : vector<16x32xf32>, vector<32x32xf32>, vector<16x32xf32> -> vector<16x32xf32>
    %99 = vector.extract_strided_slice %0 {offsets = [3, 0], sizes = [1, 32], strides = [1, 1]} : vector<21x32xf32> to vector<1x32xf32>
    %100 = vector.broadcast %99 : vector<1x32xf32> to vector<16x32xf32>
    %101 = arith.addf %98, %100 : vector<16x32xf32>
    %102 = arith.addf %1, %101 : vector<16x32xf32>
    %cst_38 = arith.constant dense<0.000000e+00> : vector<16xf32>
    %103 = vector.multi_reduction <add>, %102, %cst_38 [1] : vector<16x32xf32> to vector<16xf32>
    %104 = vector.shape_cast %103 : vector<16xf32> to vector<16x1xf32>
    %cst_39 = arith.constant 3.200000e+01 : f32
    %105 = vector.broadcast %cst_39 : f32 to vector<16x1xf32>
    %106 = arith.divf %104, %105 : vector<16x1xf32>
    %107 = vector.broadcast %106 : vector<16x1xf32> to vector<16x32xf32>
    %108 = arith.subf %102, %107 : vector<16x32xf32>
    %109 = arith.mulf %108, %108 : vector<16x32xf32>
    %cst_40 = arith.constant dense<0.000000e+00> : vector<16xf32>
    %110 = vector.multi_reduction <add>, %109, %cst_40 [1] : vector<16x32xf32> to vector<16xf32>
    %111 = vector.shape_cast %110 : vector<16xf32> to vector<16x1xf32>
    %cst_41 = arith.constant 3.200000e+01 : f32
    %112 = vector.broadcast %cst_41 : f32 to vector<16x1xf32>
    %113 = arith.divf %111, %112 : vector<16x1xf32>
    %114 = vector.broadcast %106 : vector<16x1xf32> to vector<16x32xf32>
    %115 = arith.subf %102, %114 : vector<16x32xf32>
    %cst_42 = arith.constant 9.99999974E-6 : f32
    %116 = vector.broadcast %cst_42 : f32 to vector<16x1xf32>
    %117 = arith.addf %113, %116 : vector<16x1xf32>
    %118 = math.rsqrt %117 : vector<16x1xf32>
    %119 = vector.broadcast %118 : vector<16x1xf32> to vector<16x32xf32>
    %120 = arith.mulf %115, %119 : vector<16x32xf32>
    %121 = vector.extract_strided_slice %0 {offsets = [12, 0], sizes = [1, 32], strides = [1, 1]} : vector<21x32xf32> to vector<1x32xf32>
    %122 = vector.broadcast %121 : vector<1x32xf32> to vector<16x32xf32>
    %123 = arith.mulf %120, %122 : vector<16x32xf32>
    %124 = vector.extract_strided_slice %0 {offsets = [13, 0], sizes = [1, 32], strides = [1, 1]} : vector<21x32xf32> to vector<1x32xf32>
    %125 = vector.broadcast %124 : vector<1x32xf32> to vector<16x32xf32>
    %126 = arith.addf %123, %125 : vector<16x32xf32>
    %c0_43 = arith.constant 0 : index
    %c0_44 = arith.constant 0 : index
    %127 = vector.load %arg2[%c0_43, %c0_44] : memref<16x32xf32, #tpu.memory_space<vmem>>, vector<16x32xf32>
    %128 = arith.addf %126, %2 : vector<16x32xf32>
    %c0_45 = arith.constant 0 : index
    %c0_46 = arith.constant 0 : index
    %129 = vector.load %arg3[%c0_45, %c0_46] : memref<16x32xf32, #tpu.memory_space<vmem>>, vector<16x32xf32>
    %130 = arith.addf %127, %129 : vector<16x32xf32>
    %c4 = arith.constant 4 : index
    %c0_47 = arith.constant 0 : index
    %c0_48 = arith.constant 0 : index
    %131 = vector.load %arg6[%c4, %c0_47, %c0_48] : memref<12x32x32xf32, #tpu.memory_space<vmem>>, vector<1x32x32xf32>
    %132 = vector.shape_cast %131 : vector<1x32x32xf32> to vector<32x32xf32>
    %cst_49 = arith.constant dense<0.000000e+00> : vector<16x32xf32>
    %133 = tpu.matmul %128, %132, %cst_49 {dimension_numbers = #tpu.dot_dimension_numbers<[1], [0], [0], [1], [0, 0, 1, 1], [], []>} : vector<16x32xf32>, vector<32x32xf32>, vector<16x32xf32> -> vector<16x32xf32>
    %134 = vector.extract_strided_slice %0 {offsets = [4, 0], sizes = [1, 32], strides = [1, 1]} : vector<21x32xf32> to vector<1x32xf32>
    %135 = vector.broadcast %134 : vector<1x32xf32> to vector<16x32xf32>
    %136 = arith.addf %133, %135 : vector<16x32xf32>
    %c5 = arith.constant 5 : index
    %c0_50 = arith.constant 0 : index
    %c0_51 = arith.constant 0 : index
    %137 = vector.load %arg6[%c5, %c0_50, %c0_51] : memref<12x32x32xf32, #tpu.memory_space<vmem>>, vector<1x32x32xf32>
    %138 = vector.shape_cast %137 : vector<1x32x32xf32> to vector<32x32xf32>
    %cst_52 = arith.constant dense<0.000000e+00> : vector<16x32xf32>
    %139 = tpu.matmul %130, %138, %cst_52 {dimension_numbers = #tpu.dot_dimension_numbers<[1], [0], [0], [1], [0, 0, 1, 1], [], []>} : vector<16x32xf32>, vector<32x32xf32>, vector<16x32xf32> -> vector<16x32xf32>
    %140 = vector.extract_strided_slice %0 {offsets = [5, 0], sizes = [1, 32], strides = [1, 1]} : vector<21x32xf32> to vector<1x32xf32>
    %141 = vector.broadcast %140 : vector<1x32xf32> to vector<16x32xf32>
    %142 = arith.addf %139, %141 : vector<16x32xf32>
    %c6 = arith.constant 6 : index
    %c0_53 = arith.constant 0 : index
    %c0_54 = arith.constant 0 : index
    %143 = vector.load %arg6[%c6, %c0_53, %c0_54] : memref<12x32x32xf32, #tpu.memory_space<vmem>>, vector<1x32x32xf32>
    %144 = vector.shape_cast %143 : vector<1x32x32xf32> to vector<32x32xf32>
    %cst_55 = arith.constant dense<0.000000e+00> : vector<16x32xf32>
    %145 = tpu.matmul %127, %144, %cst_55 {dimension_numbers = #tpu.dot_dimension_numbers<[1], [0], [0], [1], [0, 0, 1, 1], [], []>} : vector<16x32xf32>, vector<32x32xf32>, vector<16x32xf32> -> vector<16x32xf32>
    %146 = vector.extract_strided_slice %0 {offsets = [6, 0], sizes = [1, 32], strides = [1, 1]} : vector<21x32xf32> to vector<1x32xf32>
    %147 = vector.broadcast %146 : vector<1x32xf32> to vector<16x32xf32>
    %148 = arith.addf %145, %147 : vector<16x32xf32>
    %149 = vector.extract_strided_slice %136 {offsets = [0, 0], sizes = [16, 8], strides = [1, 1]} : vector<16x32xf32> to vector<16x8xf32>
    %150 = vector.extract_strided_slice %142 {offsets = [0, 0], sizes = [16, 8], strides = [1, 1]} : vector<16x32xf32> to vector<16x8xf32>
    %cst_56 = arith.constant dense<0.000000e+00> : vector<16x16xf32>
    %151 = tpu.matmul %149, %150, %cst_56 {dimension_numbers = #tpu.dot_dimension_numbers<[1], [1], [0], [0], [0, 0, 1, 0], [], []>} : vector<16x8xf32>, vector<16x8xf32>, vector<16x16xf32> -> vector<16x16xf32>
    %152 = vector.extract_strided_slice %136 {offsets = [0, 8], sizes = [16, 8], strides = [1, 1]} : vector<16x32xf32> to vector<16x8xf32>
    %153 = vector.extract_strided_slice %142 {offsets = [0, 8], sizes = [16, 8], strides = [1, 1]} : vector<16x32xf32> to vector<16x8xf32>
    %cst_57 = arith.constant dense<0.000000e+00> : vector<16x16xf32>
    %154 = tpu.matmul %152, %153, %cst_57 {dimension_numbers = #tpu.dot_dimension_numbers<[1], [1], [0], [0], [0, 0, 1, 0], [], []>} : vector<16x8xf32>, vector<16x8xf32>, vector<16x16xf32> -> vector<16x16xf32>
    %155 = vector.extract_strided_slice %136 {offsets = [0, 16], sizes = [16, 8], strides = [1, 1]} : vector<16x32xf32> to vector<16x8xf32>
    %156 = vector.extract_strided_slice %142 {offsets = [0, 16], sizes = [16, 8], strides = [1, 1]} : vector<16x32xf32> to vector<16x8xf32>
    %cst_58 = arith.constant dense<0.000000e+00> : vector<16x16xf32>
    %157 = tpu.matmul %155, %156, %cst_58 {dimension_numbers = #tpu.dot_dimension_numbers<[1], [1], [0], [0], [0, 0, 1, 0], [], []>} : vector<16x8xf32>, vector<16x8xf32>, vector<16x16xf32> -> vector<16x16xf32>
    %158 = vector.extract_strided_slice %136 {offsets = [0, 24], sizes = [16, 8], strides = [1, 1]} : vector<16x32xf32> to vector<16x8xf32>
    %159 = vector.extract_strided_slice %142 {offsets = [0, 24], sizes = [16, 8], strides = [1, 1]} : vector<16x32xf32> to vector<16x8xf32>
    %cst_59 = arith.constant dense<0.000000e+00> : vector<16x16xf32>
    %160 = tpu.matmul %158, %159, %cst_59 {dimension_numbers = #tpu.dot_dimension_numbers<[1], [1], [0], [0], [0, 0, 1, 0], [], []>} : vector<16x8xf32>, vector<16x8xf32>, vector<16x16xf32> -> vector<16x16xf32>
    %161 = tpu.concatenate %151, %154, %157, %160 in 0 : vector<16x16xf32>, vector<16x16xf32>, vector<16x16xf32>, vector<16x16xf32> -> vector<64x16xf32>
    %cst_60 = arith.constant 0.353553385 : f32
    %162 = vector.broadcast %cst_60 : f32 to vector<64x16xf32>
    %163 = arith.mulf %161, %162 : vector<64x16xf32>
    %164 = tpu.iota {dimensions = array<i32: 0>} : vector<64x16xi32>
    %165 = tpu.iota {dimensions = array<i32: 1>} : vector<64x16xi32>
    %c2_i32_61 = arith.constant 2 : i32
    %c0_i32_62 = arith.constant 0 : i32
    %166 = arith.cmpi eq, %c2_i32_61, %c0_i32_62 : i32
    %c1_i32_63 = arith.constant 1 : i32
    %167 = arith.select %166, %c1_i32_63, %c2_i32_61 : i32
    %168 = vector.broadcast %167 : i32 to vector<64x16xi32>
    %169 = arith.remsi %164, %168 : vector<64x16xi32>
    %c0_i32_64 = arith.constant 0 : i32
    %170 = vector.broadcast %c0_i32_64 : i32 to vector<64x16xi32>
    %171 = arith.cmpi ne, %169, %170 : vector<64x16xi32>
    %c0_i32_65 = arith.constant 0 : i32
    %172 = vector.broadcast %c0_i32_65 : i32 to vector<64x16xi32>
    %173 = arith.cmpi slt, %169, %172 : vector<64x16xi32>
    %c0_i32_66 = arith.constant 0 : i32
    %174 = arith.cmpi slt, %167, %c0_i32_66 : i32
    %175 = vector.broadcast %174 : i1 to vector<64x16xi1>
    %176 = vector.broadcast %175 : vector<64x16xi1> to vector<64x16xi1>
    %177 = arith.xori %173, %176 : vector<64x16xi1>
    %178 = arith.andi %177, %171 : vector<64x16xi1>
    %179 = vector.broadcast %167 : i32 to vector<64x16xi32>
    %180 = arith.addi %169, %179 : vector<64x16xi32>
    %181 = arith.select %178, %180, %169 : vector<64x16xi1>, vector<64x16xi32>
    %c2_i32_67 = arith.constant 2 : i32
    %c0_i32_68 = arith.constant 0 : i32
    %182 = arith.cmpi eq, %c2_i32_67, %c0_i32_68 : i32
    %c1_i32_69 = arith.constant 1 : i32
    %183 = arith.select %182, %c1_i32_69, %c2_i32_67 : i32
    %184 = vector.broadcast %183 : i32 to vector<64x16xi32>
    %185 = arith.remsi %165, %184 : vector<64x16xi32>
    %c0_i32_70 = arith.constant 0 : i32
    %186 = vector.broadcast %c0_i32_70 : i32 to vector<64x16xi32>
    %187 = arith.cmpi ne, %185, %186 : vector<64x16xi32>
    %c0_i32_71 = arith.constant 0 : i32
    %188 = vector.broadcast %c0_i32_71 : i32 to vector<64x16xi32>
    %189 = arith.cmpi slt, %185, %188 : vector<64x16xi32>
    %c0_i32_72 = arith.constant 0 : i32
    %190 = arith.cmpi slt, %183, %c0_i32_72 : i32
    %191 = vector.broadcast %190 : i1 to vector<64x16xi1>
    %192 = vector.broadcast %191 : vector<64x16xi1> to vector<64x16xi1>
    %193 = arith.xori %189, %192 : vector<64x16xi1>
    %194 = arith.andi %193, %187 : vector<64x16xi1>
    %195 = vector.broadcast %183 : i32 to vector<64x16xi32>
    %196 = arith.addi %185, %195 : vector<64x16xi32>
    %197 = arith.select %194, %196, %185 : vector<64x16xi1>, vector<64x16xi32>
    %198 = arith.cmpi eq, %181, %197 : vector<64x16xi32>
    %cst_73 = arith.constant -1.000000e+30 : f32
    %199 = vector.broadcast %cst_73 : f32 to vector<64x16xf32>
    %200 = arith.select %198, %163, %199 : vector<64x16xi1>, vector<64x16xf32>
    %cst_74 = arith.constant dense<0xFF800000> : vector<64xf32>
    %201 = vector.multi_reduction <maximumf>, %200, %cst_74 [1] : vector<64x16xf32> to vector<64xf32>
    %202 = vector.shape_cast %201 : vector<64xf32> to vector<64x1xf32>
    %203 = vector.broadcast %202 : vector<64x1xf32> to vector<64x16xf32>
    %204 = arith.subf %200, %203 : vector<64x16xf32>
    %205 = math.exp %204 : vector<64x16xf32>
    %cst_75 = arith.constant dense<0.000000e+00> : vector<64xf32>
    %206 = vector.multi_reduction <add>, %205, %cst_75 [1] : vector<64x16xf32> to vector<64xf32>
    %207 = vector.shape_cast %206 : vector<64xf32> to vector<64x1xf32>
    %208 = vector.broadcast %207 : vector<64x1xf32> to vector<64x16xf32>
    %209 = arith.divf %205, %208 : vector<64x16xf32>
    %210 = vector.extract_strided_slice %209 {offsets = [0, 0], sizes = [16, 16], strides = [1, 1]} : vector<64x16xf32> to vector<16x16xf32>
    %211 = vector.extract_strided_slice %148 {offsets = [0, 0], sizes = [16, 8], strides = [1, 1]} : vector<16x32xf32> to vector<16x8xf32>
    %cst_76 = arith.constant dense<0.000000e+00> : vector<16x8xf32>
    %212 = tpu.matmul %210, %211, %cst_76 {dimension_numbers = #tpu.dot_dimension_numbers<[1], [0], [0], [1], [0, 0, 1, 1], [], []>} : vector<16x16xf32>, vector<16x8xf32>, vector<16x8xf32> -> vector<16x8xf32>
    %213 = vector.extract_strided_slice %209 {offsets = [16, 0], sizes = [16, 16], strides = [1, 1]} : vector<64x16xf32> to vector<16x16xf32>
    %214 = vector.extract_strided_slice %148 {offsets = [0, 8], sizes = [16, 8], strides = [1, 1]} : vector<16x32xf32> to vector<16x8xf32>
    %cst_77 = arith.constant dense<0.000000e+00> : vector<16x8xf32>
    %215 = tpu.matmul %213, %214, %cst_77 {dimension_numbers = #tpu.dot_dimension_numbers<[1], [0], [0], [1], [0, 0, 1, 1], [], []>} : vector<16x16xf32>, vector<16x8xf32>, vector<16x8xf32> -> vector<16x8xf32>
    %216 = vector.extract_strided_slice %209 {offsets = [32, 0], sizes = [16, 16], strides = [1, 1]} : vector<64x16xf32> to vector<16x16xf32>
    %217 = vector.extract_strided_slice %148 {offsets = [0, 16], sizes = [16, 8], strides = [1, 1]} : vector<16x32xf32> to vector<16x8xf32>
    %cst_78 = arith.constant dense<0.000000e+00> : vector<16x8xf32>
    %218 = tpu.matmul %216, %217, %cst_78 {dimension_numbers = #tpu.dot_dimension_numbers<[1], [0], [0], [1], [0, 0, 1, 1], [], []>} : vector<16x16xf32>, vector<16x8xf32>, vector<16x8xf32> -> vector<16x8xf32>
    %219 = vector.extract_strided_slice %209 {offsets = [48, 0], sizes = [16, 16], strides = [1, 1]} : vector<64x16xf32> to vector<16x16xf32>
    %220 = vector.extract_strided_slice %148 {offsets = [0, 24], sizes = [16, 8], strides = [1, 1]} : vector<16x32xf32> to vector<16x8xf32>
    %cst_79 = arith.constant dense<0.000000e+00> : vector<16x8xf32>
    %221 = tpu.matmul %219, %220, %cst_79 {dimension_numbers = #tpu.dot_dimension_numbers<[1], [0], [0], [1], [0, 0, 1, 1], [], []>} : vector<16x16xf32>, vector<16x8xf32>, vector<16x8xf32> -> vector<16x8xf32>
    %222 = tpu.concatenate %212, %215, %218, %221 in 1 : vector<16x8xf32>, vector<16x8xf32>, vector<16x8xf32>, vector<16x8xf32> -> vector<16x32xf32>
    %c7 = arith.constant 7 : index
    %c0_80 = arith.constant 0 : index
    %c0_81 = arith.constant 0 : index
    %223 = vector.load %arg6[%c7, %c0_80, %c0_81] : memref<12x32x32xf32, #tpu.memory_space<vmem>>, vector<1x32x32xf32>
    %224 = vector.shape_cast %223 : vector<1x32x32xf32> to vector<32x32xf32>
    %cst_82 = arith.constant dense<0.000000e+00> : vector<16x32xf32>
    %225 = tpu.matmul %222, %224, %cst_82 {dimension_numbers = #tpu.dot_dimension_numbers<[1], [0], [0], [1], [0, 0, 1, 1], [], []>} : vector<16x32xf32>, vector<32x32xf32>, vector<16x32xf32> -> vector<16x32xf32>
    %226 = vector.extract_strided_slice %0 {offsets = [7, 0], sizes = [1, 32], strides = [1, 1]} : vector<21x32xf32> to vector<1x32xf32>
    %227 = vector.broadcast %226 : vector<1x32xf32> to vector<16x32xf32>
    %228 = arith.addf %225, %227 : vector<16x32xf32>
    %229 = arith.addf %126, %228 : vector<16x32xf32>
    %cst_83 = arith.constant dense<0.000000e+00> : vector<16xf32>
    %230 = vector.multi_reduction <add>, %229, %cst_83 [1] : vector<16x32xf32> to vector<16xf32>
    %231 = vector.shape_cast %230 : vector<16xf32> to vector<16x1xf32>
    %cst_84 = arith.constant 3.200000e+01 : f32
    %232 = vector.broadcast %cst_84 : f32 to vector<16x1xf32>
    %233 = arith.divf %231, %232 : vector<16x1xf32>
    %234 = vector.broadcast %233 : vector<16x1xf32> to vector<16x32xf32>
    %235 = arith.subf %229, %234 : vector<16x32xf32>
    %236 = arith.mulf %235, %235 : vector<16x32xf32>
    %cst_85 = arith.constant dense<0.000000e+00> : vector<16xf32>
    %237 = vector.multi_reduction <add>, %236, %cst_85 [1] : vector<16x32xf32> to vector<16xf32>
    %238 = vector.shape_cast %237 : vector<16xf32> to vector<16x1xf32>
    %cst_86 = arith.constant 3.200000e+01 : f32
    %239 = vector.broadcast %cst_86 : f32 to vector<16x1xf32>
    %240 = arith.divf %238, %239 : vector<16x1xf32>
    %241 = vector.broadcast %233 : vector<16x1xf32> to vector<16x32xf32>
    %242 = arith.subf %229, %241 : vector<16x32xf32>
    %cst_87 = arith.constant 9.99999974E-6 : f32
    %243 = vector.broadcast %cst_87 : f32 to vector<16x1xf32>
    %244 = arith.addf %240, %243 : vector<16x1xf32>
    %245 = math.rsqrt %244 : vector<16x1xf32>
    %246 = vector.broadcast %245 : vector<16x1xf32> to vector<16x32xf32>
    %247 = arith.mulf %242, %246 : vector<16x32xf32>
    %248 = vector.extract_strided_slice %0 {offsets = [14, 0], sizes = [1, 32], strides = [1, 1]} : vector<21x32xf32> to vector<1x32xf32>
    %249 = vector.broadcast %248 : vector<1x32xf32> to vector<16x32xf32>
    %250 = arith.mulf %247, %249 : vector<16x32xf32>
    %251 = vector.extract_strided_slice %0 {offsets = [15, 0], sizes = [1, 32], strides = [1, 1]} : vector<21x32xf32> to vector<1x32xf32>
    %252 = vector.broadcast %251 : vector<1x32xf32> to vector<16x32xf32>
    %253 = arith.addf %250, %252 : vector<16x32xf32>
    %c0_88 = arith.constant 0 : index
    %c0_89 = arith.constant 0 : index
    %254 = vector.load %arg4[%c0_88, %c0_89] : memref<24x32xf32, #tpu.memory_space<vmem>>, vector<24x32xf32>
    %255 = arith.addf %253, %2 : vector<16x32xf32>
    %c0_90 = arith.constant 0 : index
    %c0_91 = arith.constant 0 : index
    %256 = vector.load %arg5[%c0_90, %c0_91] : memref<24x32xf32, #tpu.memory_space<vmem>>, vector<24x32xf32>
    %257 = arith.addf %254, %256 : vector<24x32xf32>
    %c8 = arith.constant 8 : index
    %c0_92 = arith.constant 0 : index
    %c0_93 = arith.constant 0 : index
    %258 = vector.load %arg6[%c8, %c0_92, %c0_93] : memref<12x32x32xf32, #tpu.memory_space<vmem>>, vector<1x32x32xf32>
    %259 = vector.shape_cast %258 : vector<1x32x32xf32> to vector<32x32xf32>
    %cst_94 = arith.constant dense<0.000000e+00> : vector<16x32xf32>
    %260 = tpu.matmul %255, %259, %cst_94 {dimension_numbers = #tpu.dot_dimension_numbers<[1], [0], [0], [1], [0, 0, 1, 1], [], []>} : vector<16x32xf32>, vector<32x32xf32>, vector<16x32xf32> -> vector<16x32xf32>
    %261 = vector.extract_strided_slice %0 {offsets = [8, 0], sizes = [1, 32], strides = [1, 1]} : vector<21x32xf32> to vector<1x32xf32>
    %262 = vector.broadcast %261 : vector<1x32xf32> to vector<16x32xf32>
    %263 = arith.addf %260, %262 : vector<16x32xf32>
    %c9 = arith.constant 9 : index
    %c0_95 = arith.constant 0 : index
    %c0_96 = arith.constant 0 : index
    %264 = vector.load %arg6[%c9, %c0_95, %c0_96] : memref<12x32x32xf32, #tpu.memory_space<vmem>>, vector<1x32x32xf32>
    %265 = vector.shape_cast %264 : vector<1x32x32xf32> to vector<32x32xf32>
    %cst_97 = arith.constant dense<0.000000e+00> : vector<24x32xf32>
    %266 = tpu.matmul %257, %265, %cst_97 {dimension_numbers = #tpu.dot_dimension_numbers<[1], [0], [0], [1], [0, 0, 1, 1], [], []>} : vector<24x32xf32>, vector<32x32xf32>, vector<24x32xf32> -> vector<24x32xf32>
    %267 = vector.extract_strided_slice %0 {offsets = [9, 0], sizes = [1, 32], strides = [1, 1]} : vector<21x32xf32> to vector<1x32xf32>
    %268 = vector.broadcast %267 : vector<1x32xf32> to vector<24x32xf32>
    %269 = arith.addf %266, %268 : vector<24x32xf32>
    %c10 = arith.constant 10 : index
    %c0_98 = arith.constant 0 : index
    %c0_99 = arith.constant 0 : index
    %270 = vector.load %arg6[%c10, %c0_98, %c0_99] : memref<12x32x32xf32, #tpu.memory_space<vmem>>, vector<1x32x32xf32>
    %271 = vector.shape_cast %270 : vector<1x32x32xf32> to vector<32x32xf32>
    %cst_100 = arith.constant dense<0.000000e+00> : vector<24x32xf32>
    %272 = tpu.matmul %254, %271, %cst_100 {dimension_numbers = #tpu.dot_dimension_numbers<[1], [0], [0], [1], [0, 0, 1, 1], [], []>} : vector<24x32xf32>, vector<32x32xf32>, vector<24x32xf32> -> vector<24x32xf32>
    %273 = vector.extract_strided_slice %0 {offsets = [10, 0], sizes = [1, 32], strides = [1, 1]} : vector<21x32xf32> to vector<1x32xf32>
    %274 = vector.broadcast %273 : vector<1x32xf32> to vector<24x32xf32>
    %275 = arith.addf %272, %274 : vector<24x32xf32>
    %276 = vector.extract_strided_slice %263 {offsets = [0, 0], sizes = [16, 8], strides = [1, 1]} : vector<16x32xf32> to vector<16x8xf32>
    %277 = vector.extract_strided_slice %269 {offsets = [0, 0], sizes = [24, 8], strides = [1, 1]} : vector<24x32xf32> to vector<24x8xf32>
    %cst_101 = arith.constant dense<0.000000e+00> : vector<16x24xf32>
    %278 = tpu.matmul %276, %277, %cst_101 {dimension_numbers = #tpu.dot_dimension_numbers<[1], [1], [0], [0], [0, 0, 1, 0], [], []>} : vector<16x8xf32>, vector<24x8xf32>, vector<16x24xf32> -> vector<16x24xf32>
    %279 = vector.extract_strided_slice %263 {offsets = [0, 8], sizes = [16, 8], strides = [1, 1]} : vector<16x32xf32> to vector<16x8xf32>
    %280 = vector.extract_strided_slice %269 {offsets = [0, 8], sizes = [24, 8], strides = [1, 1]} : vector<24x32xf32> to vector<24x8xf32>
    %cst_102 = arith.constant dense<0.000000e+00> : vector<16x24xf32>
    %281 = tpu.matmul %279, %280, %cst_102 {dimension_numbers = #tpu.dot_dimension_numbers<[1], [1], [0], [0], [0, 0, 1, 0], [], []>} : vector<16x8xf32>, vector<24x8xf32>, vector<16x24xf32> -> vector<16x24xf32>
    %282 = vector.extract_strided_slice %263 {offsets = [0, 16], sizes = [16, 8], strides = [1, 1]} : vector<16x32xf32> to vector<16x8xf32>
    %283 = vector.extract_strided_slice %269 {offsets = [0, 16], sizes = [24, 8], strides = [1, 1]} : vector<24x32xf32> to vector<24x8xf32>
    %cst_103 = arith.constant dense<0.000000e+00> : vector<16x24xf32>
    %284 = tpu.matmul %282, %283, %cst_103 {dimension_numbers = #tpu.dot_dimension_numbers<[1], [1], [0], [0], [0, 0, 1, 0], [], []>} : vector<16x8xf32>, vector<24x8xf32>, vector<16x24xf32> -> vector<16x24xf32>
    %285 = vector.extract_strided_slice %263 {offsets = [0, 24], sizes = [16, 8], strides = [1, 1]} : vector<16x32xf32> to vector<16x8xf32>
    %286 = vector.extract_strided_slice %269 {offsets = [0, 24], sizes = [24, 8], strides = [1, 1]} : vector<24x32xf32> to vector<24x8xf32>
    %cst_104 = arith.constant dense<0.000000e+00> : vector<16x24xf32>
    %287 = tpu.matmul %285, %286, %cst_104 {dimension_numbers = #tpu.dot_dimension_numbers<[1], [1], [0], [0], [0, 0, 1, 0], [], []>} : vector<16x8xf32>, vector<24x8xf32>, vector<16x24xf32> -> vector<16x24xf32>
    %288 = tpu.concatenate %278, %281, %284, %287 in 0 : vector<16x24xf32>, vector<16x24xf32>, vector<16x24xf32>, vector<16x24xf32> -> vector<64x24xf32>
    %cst_105 = arith.constant 0.353553385 : f32
    %289 = vector.broadcast %cst_105 : f32 to vector<64x24xf32>
    %290 = arith.mulf %288, %289 : vector<64x24xf32>
    %291 = tpu.iota {dimensions = array<i32: 0>} : vector<64x24xi32>
    %292 = tpu.iota {dimensions = array<i32: 1>} : vector<64x24xi32>
    %c2_i32_106 = arith.constant 2 : i32
    %c0_i32_107 = arith.constant 0 : i32
    %293 = arith.cmpi eq, %c2_i32_106, %c0_i32_107 : i32
    %c1_i32_108 = arith.constant 1 : i32
    %294 = arith.select %293, %c1_i32_108, %c2_i32_106 : i32
    %295 = vector.broadcast %294 : i32 to vector<64x24xi32>
    %296 = arith.remsi %291, %295 : vector<64x24xi32>
    %c0_i32_109 = arith.constant 0 : i32
    %297 = vector.broadcast %c0_i32_109 : i32 to vector<64x24xi32>
    %298 = arith.cmpi ne, %296, %297 : vector<64x24xi32>
    %c0_i32_110 = arith.constant 0 : i32
    %299 = vector.broadcast %c0_i32_110 : i32 to vector<64x24xi32>
    %300 = arith.cmpi slt, %296, %299 : vector<64x24xi32>
    %c0_i32_111 = arith.constant 0 : i32
    %301 = arith.cmpi slt, %294, %c0_i32_111 : i32
    %302 = vector.broadcast %301 : i1 to vector<64x24xi1>
    %303 = vector.broadcast %302 : vector<64x24xi1> to vector<64x24xi1>
    %304 = arith.xori %300, %303 : vector<64x24xi1>
    %305 = arith.andi %304, %298 : vector<64x24xi1>
    %306 = vector.broadcast %294 : i32 to vector<64x24xi32>
    %307 = arith.addi %296, %306 : vector<64x24xi32>
    %308 = arith.select %305, %307, %296 : vector<64x24xi1>, vector<64x24xi32>
    %c2_i32_112 = arith.constant 2 : i32
    %c0_i32_113 = arith.constant 0 : i32
    %309 = arith.cmpi eq, %c2_i32_112, %c0_i32_113 : i32
    %c1_i32_114 = arith.constant 1 : i32
    %310 = arith.select %309, %c1_i32_114, %c2_i32_112 : i32
    %311 = vector.broadcast %310 : i32 to vector<64x24xi32>
    %312 = arith.remsi %292, %311 : vector<64x24xi32>
    %c0_i32_115 = arith.constant 0 : i32
    %313 = vector.broadcast %c0_i32_115 : i32 to vector<64x24xi32>
    %314 = arith.cmpi ne, %312, %313 : vector<64x24xi32>
    %c0_i32_116 = arith.constant 0 : i32
    %315 = vector.broadcast %c0_i32_116 : i32 to vector<64x24xi32>
    %316 = arith.cmpi slt, %312, %315 : vector<64x24xi32>
    %c0_i32_117 = arith.constant 0 : i32
    %317 = arith.cmpi slt, %310, %c0_i32_117 : i32
    %318 = vector.broadcast %317 : i1 to vector<64x24xi1>
    %319 = vector.broadcast %318 : vector<64x24xi1> to vector<64x24xi1>
    %320 = arith.xori %316, %319 : vector<64x24xi1>
    %321 = arith.andi %320, %314 : vector<64x24xi1>
    %322 = vector.broadcast %310 : i32 to vector<64x24xi32>
    %323 = arith.addi %312, %322 : vector<64x24xi32>
    %324 = arith.select %321, %323, %312 : vector<64x24xi1>, vector<64x24xi32>
    %325 = arith.cmpi eq, %308, %324 : vector<64x24xi32>
    %cst_118 = arith.constant -1.000000e+30 : f32
    %326 = vector.broadcast %cst_118 : f32 to vector<64x24xf32>
    %327 = arith.select %325, %290, %326 : vector<64x24xi1>, vector<64x24xf32>
    %cst_119 = arith.constant dense<0xFF800000> : vector<64xf32>
    %328 = vector.multi_reduction <maximumf>, %327, %cst_119 [1] : vector<64x24xf32> to vector<64xf32>
    %329 = vector.shape_cast %328 : vector<64xf32> to vector<64x1xf32>
    %330 = vector.broadcast %329 : vector<64x1xf32> to vector<64x24xf32>
    %331 = arith.subf %327, %330 : vector<64x24xf32>
    %332 = math.exp %331 : vector<64x24xf32>
    %cst_120 = arith.constant dense<0.000000e+00> : vector<64xf32>
    %333 = vector.multi_reduction <add>, %332, %cst_120 [1] : vector<64x24xf32> to vector<64xf32>
    %334 = vector.shape_cast %333 : vector<64xf32> to vector<64x1xf32>
    %335 = vector.broadcast %334 : vector<64x1xf32> to vector<64x24xf32>
    %336 = arith.divf %332, %335 : vector<64x24xf32>
    %337 = vector.extract_strided_slice %336 {offsets = [0, 0], sizes = [16, 24], strides = [1, 1]} : vector<64x24xf32> to vector<16x24xf32>
    %338 = vector.extract_strided_slice %275 {offsets = [0, 0], sizes = [24, 8], strides = [1, 1]} : vector<24x32xf32> to vector<24x8xf32>
    %cst_121 = arith.constant dense<0.000000e+00> : vector<16x8xf32>
    %339 = tpu.matmul %337, %338, %cst_121 {dimension_numbers = #tpu.dot_dimension_numbers<[1], [0], [0], [1], [0, 0, 1, 1], [], []>} : vector<16x24xf32>, vector<24x8xf32>, vector<16x8xf32> -> vector<16x8xf32>
    %340 = vector.extract_strided_slice %336 {offsets = [16, 0], sizes = [16, 24], strides = [1, 1]} : vector<64x24xf32> to vector<16x24xf32>
    %341 = vector.extract_strided_slice %275 {offsets = [0, 8], sizes = [24, 8], strides = [1, 1]} : vector<24x32xf32> to vector<24x8xf32>
    %cst_122 = arith.constant dense<0.000000e+00> : vector<16x8xf32>
    %342 = tpu.matmul %340, %341, %cst_122 {dimension_numbers = #tpu.dot_dimension_numbers<[1], [0], [0], [1], [0, 0, 1, 1], [], []>} : vector<16x24xf32>, vector<24x8xf32>, vector<16x8xf32> -> vector<16x8xf32>
    %343 = vector.extract_strided_slice %336 {offsets = [32, 0], sizes = [16, 24], strides = [1, 1]} : vector<64x24xf32> to vector<16x24xf32>
    %344 = vector.extract_strided_slice %275 {offsets = [0, 16], sizes = [24, 8], strides = [1, 1]} : vector<24x32xf32> to vector<24x8xf32>
    %cst_123 = arith.constant dense<0.000000e+00> : vector<16x8xf32>
    %345 = tpu.matmul %343, %344, %cst_123 {dimension_numbers = #tpu.dot_dimension_numbers<[1], [0], [0], [1], [0, 0, 1, 1], [], []>} : vector<16x24xf32>, vector<24x8xf32>, vector<16x8xf32> -> vector<16x8xf32>
    %346 = vector.extract_strided_slice %336 {offsets = [48, 0], sizes = [16, 24], strides = [1, 1]} : vector<64x24xf32> to vector<16x24xf32>
    %347 = vector.extract_strided_slice %275 {offsets = [0, 24], sizes = [24, 8], strides = [1, 1]} : vector<24x32xf32> to vector<24x8xf32>
    %cst_124 = arith.constant dense<0.000000e+00> : vector<16x8xf32>
    %348 = tpu.matmul %346, %347, %cst_124 {dimension_numbers = #tpu.dot_dimension_numbers<[1], [0], [0], [1], [0, 0, 1, 1], [], []>} : vector<16x24xf32>, vector<24x8xf32>, vector<16x8xf32> -> vector<16x8xf32>
    %349 = tpu.concatenate %339, %342, %345, %348 in 1 : vector<16x8xf32>, vector<16x8xf32>, vector<16x8xf32>, vector<16x8xf32> -> vector<16x32xf32>
    %c11 = arith.constant 11 : index
    %c0_125 = arith.constant 0 : index
    %c0_126 = arith.constant 0 : index
    %350 = vector.load %arg6[%c11, %c0_125, %c0_126] : memref<12x32x32xf32, #tpu.memory_space<vmem>>, vector<1x32x32xf32>
    %351 = vector.shape_cast %350 : vector<1x32x32xf32> to vector<32x32xf32>
    %cst_127 = arith.constant dense<0.000000e+00> : vector<16x32xf32>
    %352 = tpu.matmul %349, %351, %cst_127 {dimension_numbers = #tpu.dot_dimension_numbers<[1], [0], [0], [1], [0, 0, 1, 1], [], []>} : vector<16x32xf32>, vector<32x32xf32>, vector<16x32xf32> -> vector<16x32xf32>
    %353 = vector.extract_strided_slice %0 {offsets = [11, 0], sizes = [1, 32], strides = [1, 1]} : vector<21x32xf32> to vector<1x32xf32>
    %354 = vector.broadcast %353 : vector<1x32xf32> to vector<16x32xf32>
    %355 = arith.addf %352, %354 : vector<16x32xf32>
    %356 = arith.addf %253, %355 : vector<16x32xf32>
    %cst_128 = arith.constant dense<0.000000e+00> : vector<16xf32>
    %357 = vector.multi_reduction <add>, %356, %cst_128 [1] : vector<16x32xf32> to vector<16xf32>
    %358 = vector.shape_cast %357 : vector<16xf32> to vector<16x1xf32>
    %cst_129 = arith.constant 3.200000e+01 : f32
    %359 = vector.broadcast %cst_129 : f32 to vector<16x1xf32>
    %360 = arith.divf %358, %359 : vector<16x1xf32>
    %361 = vector.broadcast %360 : vector<16x1xf32> to vector<16x32xf32>
    %362 = arith.subf %356, %361 : vector<16x32xf32>
    %363 = arith.mulf %362, %362 : vector<16x32xf32>
    %cst_130 = arith.constant dense<0.000000e+00> : vector<16xf32>
    %364 = vector.multi_reduction <add>, %363, %cst_130 [1] : vector<16x32xf32> to vector<16xf32>
    %365 = vector.shape_cast %364 : vector<16xf32> to vector<16x1xf32>
    %cst_131 = arith.constant 3.200000e+01 : f32
    %366 = vector.broadcast %cst_131 : f32 to vector<16x1xf32>
    %367 = arith.divf %365, %366 : vector<16x1xf32>
    %368 = vector.broadcast %360 : vector<16x1xf32> to vector<16x32xf32>
    %369 = arith.subf %356, %368 : vector<16x32xf32>
    %cst_132 = arith.constant 9.99999974E-6 : f32
    %370 = vector.broadcast %cst_132 : f32 to vector<16x1xf32>
    %371 = arith.addf %367, %370 : vector<16x1xf32>
    %372 = math.rsqrt %371 : vector<16x1xf32>
    %373 = vector.broadcast %372 : vector<16x1xf32> to vector<16x32xf32>
    %374 = arith.mulf %369, %373 : vector<16x32xf32>
    %375 = vector.extract_strided_slice %0 {offsets = [16, 0], sizes = [1, 32], strides = [1, 1]} : vector<21x32xf32> to vector<1x32xf32>
    %376 = vector.broadcast %375 : vector<1x32xf32> to vector<16x32xf32>
    %377 = arith.mulf %374, %376 : vector<16x32xf32>
    %378 = vector.extract_strided_slice %0 {offsets = [17, 0], sizes = [1, 32], strides = [1, 1]} : vector<21x32xf32> to vector<1x32xf32>
    %379 = vector.broadcast %378 : vector<1x32xf32> to vector<16x32xf32>
    %380 = arith.addf %377, %379 : vector<16x32xf32>
    %c0_133 = arith.constant 0 : index
    %c0_134 = arith.constant 0 : index
    %381 = vector.load %arg8[%c0_133, %c0_134] : memref<32x64xf32, #tpu.memory_space<vmem>>, vector<32x64xf32>
    %cst_135 = arith.constant dense<0.000000e+00> : vector<16x64xf32>
    %382 = tpu.matmul %380, %381, %cst_135 {dimension_numbers = #tpu.dot_dimension_numbers<[1], [0], [0], [1], [0, 0, 1, 1], [], []>} : vector<16x32xf32>, vector<32x64xf32>, vector<16x64xf32> -> vector<16x64xf32>
    %c0_136 = arith.constant 0 : index
    %c0_137 = arith.constant 0 : index
    %383 = vector.load %arg9[%c0_136, %c0_137] : memref<1x64xf32, #tpu.memory_space<vmem>>, vector<1x64xf32>
    %384 = vector.broadcast %383 : vector<1x64xf32> to vector<16x64xf32>
    %385 = arith.addf %382, %384 : vector<16x64xf32>
    %cst_138 = arith.constant 0.000000e+00 : f32
    %386 = vector.broadcast %cst_138 : f32 to vector<16x64xf32>
    %387 = arith.maximumf %385, %386 : vector<16x64xf32>
    %c0_139 = arith.constant 0 : index
    %c0_140 = arith.constant 0 : index
    %388 = vector.load %arg10[%c0_139, %c0_140] : memref<64x32xf32, #tpu.memory_space<vmem>>, vector<64x32xf32>
    %cst_141 = arith.constant dense<0.000000e+00> : vector<16x32xf32>
    %389 = tpu.matmul %387, %388, %cst_141 {dimension_numbers = #tpu.dot_dimension_numbers<[1], [0], [0], [1], [0, 0, 1, 1], [], []>} : vector<16x64xf32>, vector<64x32xf32>, vector<16x32xf32> -> vector<16x32xf32>
    %390 = vector.extract_strided_slice %0 {offsets = [20, 0], sizes = [1, 32], strides = [1, 1]} : vector<21x32xf32> to vector<1x32xf32>
    %391 = vector.broadcast %390 : vector<1x32xf32> to vector<16x32xf32>
    %392 = arith.addf %389, %391 : vector<16x32xf32>
    %393 = arith.addf %380, %392 : vector<16x32xf32>
    %cst_142 = arith.constant dense<0.000000e+00> : vector<16xf32>
    %394 = vector.multi_reduction <add>, %393, %cst_142 [1] : vector<16x32xf32> to vector<16xf32>
    %395 = vector.shape_cast %394 : vector<16xf32> to vector<16x1xf32>
    %cst_143 = arith.constant 3.200000e+01 : f32
    %396 = vector.broadcast %cst_143 : f32 to vector<16x1xf32>
    %397 = arith.divf %395, %396 : vector<16x1xf32>
    %398 = vector.broadcast %397 : vector<16x1xf32> to vector<16x32xf32>
    %399 = arith.subf %393, %398 : vector<16x32xf32>
    %400 = arith.mulf %399, %399 : vector<16x32xf32>
    %cst_144 = arith.constant dense<0.000000e+00> : vector<16xf32>
    %401 = vector.multi_reduction <add>, %400, %cst_144 [1] : vector<16x32xf32> to vector<16xf32>
    %402 = vector.shape_cast %401 : vector<16xf32> to vector<16x1xf32>
    %cst_145 = arith.constant 3.200000e+01 : f32
    %403 = vector.broadcast %cst_145 : f32 to vector<16x1xf32>
    %404 = arith.divf %402, %403 : vector<16x1xf32>
    %405 = vector.broadcast %397 : vector<16x1xf32> to vector<16x32xf32>
    %406 = arith.subf %393, %405 : vector<16x32xf32>
    %cst_146 = arith.constant 9.99999974E-6 : f32
    %407 = vector.broadcast %cst_146 : f32 to vector<16x1xf32>
    %408 = arith.addf %404, %407 : vector<16x1xf32>
    %409 = math.rsqrt %408 : vector<16x1xf32>
    %410 = vector.broadcast %409 : vector<16x1xf32> to vector<16x32xf32>
    %411 = arith.mulf %406, %410 : vector<16x32xf32>
    %412 = vector.extract_strided_slice %0 {offsets = [18, 0], sizes = [1, 32], strides = [1, 1]} : vector<21x32xf32> to vector<1x32xf32>
    %413 = vector.broadcast %412 : vector<1x32xf32> to vector<16x32xf32>
    %414 = arith.mulf %411, %413 : vector<16x32xf32>
    %415 = vector.extract_strided_slice %0 {offsets = [19, 0], sizes = [1, 32], strides = [1, 1]} : vector<21x32xf32> to vector<1x32xf32>
    %416 = vector.broadcast %415 : vector<1x32xf32> to vector<16x32xf32>
    %417 = arith.addf %414, %416 : vector<16x32xf32>
    %c0_147 = arith.constant 0 : index
    %c0_148 = arith.constant 0 : index
    %418 = vector.load %arg11[%c0_147, %c0_148] : memref<16x32xf32, #tpu.memory_space<vmem>>, vector<16x32xf32>
    tpu.vector_store %arg11[%c0_147, %c0_148], %417 {strides = array<i32>} : memref<16x32xf32, #tpu.memory_space<vmem>>, vector<16x32xf32>,
    return
  }
}

</mosaic_0001>

<bundles_post_ra>
// kernel: attn_layer_forward.1
= control target key start
LH: loop header
LB: loop body
LE: loop exit
PB: predicated region body
PF: predicated region fallthrough
CT: control target
= control target key end

     0   :  { %16 = vsyncpa [#allocation3], 0  ;;  %s6289_s0 = inlined_call_operand.vmem [shape: f32[16,32], index: 0, kind: input, shape index: {}]   ;;  %s6290_s1 = inlined_call_operand.vmem [shape: f32[16,32], index: 1, kind: input, shape index: {}]   ;;  %s6291_s2 = inlined_call_operand.hbm [shape: f32[16,32], index: 2, kind: input, shape index: {}]   ;;  %s6292_s3 = inlined_call_operand.hbm [shape: f32[16,32], index: 3, kind: input, shape index: {}]   ;;  %s6293_s4 = inlined_call_operand.vmem [shape: f32[24,32], index: 4, kind: input, shape index: {}]   ;;  %s6294_s5 = inlined_call_operand.vmem [shape: f32[24,32], index: 5, kind: input, shape index: {}]   ;;  %s6295_s6 = inlined_call_operand.hbm [shape: f32[12,32,32], index: 6, kind: input, shape index: {}]   ;;  %s6296_s7 = inlined_call_operand.hbm [shape: f32[21,32], index: 7, kind: input, shape index: {}]   ;;  %s6297_s8 = inlined_call_operand.vmem [shape: f32[32,64], index: 8, kind: input, shape index: {}]   ;;  %s6298_s9 = inlined_call_operand.vmem [shape: f32[1,64], index: 9, kind: input, shape index: {}]   ;;  %s6299_s10 = inlined_call_operand.vmem [shape: f32[64,32], index: 10, kind: input, shape index: {}]   ;;  %s6300_s11 = inlined_call_operand.hbm [shape: f32[16,32], index: 11, kind: output, shape index: {}]  }
   0x1   :  { %17 = vsyncpa [#allocation6], 0 }
   0x2   :  { %18 = vsyncpa [#allocation9], 0 }
   0x3   :  { %19 = vsyncpa [#allocation4], 0  ;;  %s5485_s17 = smov [#allocation5]   ;;  %s5486_s19 = smov [#allocation2]  }
   0x4   :  { %s41_s18 = sshll.u32 %s5485_s17, 4  ;;  %s29_s20 = sshll.u32 %s5486_s19, 4  ;;  %s42_s18 = int_to_ptr.vmem [resolvable:$true] %s41_s18  ;;  %s5560_s20 = int_to_ptr.vmem [resolvable:$true] %s29_s20 }
   0x5   :  { %s5367_s23 = scalar_lea.hbm %s6292_s3, 256 }
   0x6   :  { %p5368_p0 = scmp.ne.s32.totalorder %s6292_s3, %s5367_s23  ;;  %p5371_p1 = scmp.lt.u32.totalorder %s5367_s23, %s6292_s3 }
   0x8   :  { %p5373_p2 = pnand %p5371_p1, %p5368_p0 }
   0xa   :  { %5376 = shalt.err (!%p5373_p2)
}
   0xb   :  { %s5377_s28 = scalar_lea.vmem %s42_s18, 256  ;;  %p5382_p4 = scmp.lt.s32.totalorder %s42_s18, %s42_s18 }
   0xc   :  { %p5378_p3 = scmp.ne.s32.totalorder %s42_s18, %s5377_s28  ;;  %p5383_p5 = scmp.lt.s32.totalorder %s5377_s28, %s5377_s28 }
   0xe   :  { %p5384_p6 = por %p5383_p5, %p5382_p4 }
  0x10   :  { %p5385_p7 = pnand %p5384_p6, %p5378_p3 }
  0x12   :  { %5388 = shalt.err (!%p5385_p7)
}
  0x13   :  { %s5487_s29 = smov 128   ;;  %s5488_s30 = smov 8  }
  0x14   :  { %47 = dma.hbm_to_vmem [thread:$0]  %s6292_s3, 256, %s42_s18, [#allocation6], %s5487_s29, %s5487_s29, %s5488_s30  }
  0x15   :  { %s5389_s16 = scalar_lea.hbm %s6291_s2, 256 }
  0x16   :  { %p5390_p8 = scmp.ne.s32.totalorder %s6291_s2, %s5389_s16  ;;  %p5393_p9 = scmp.lt.u32.totalorder %s5389_s16, %s6291_s2 }
  0x18   :  { %p5395_p10 = pnand %p5393_p9, %p5390_p8 }
  0x1a   :  { %5398 = shalt.err (!%p5395_p10)
}
  0x1b   :  { %s5399_s23 = scalar_lea.vmem %s5560_s20, 256  ;;  %p5404_p12 = scmp.lt.s32.totalorder %s5560_s20, %s5560_s20 }
  0x1c   :  { %p5400_p11 = scmp.ne.s32.totalorder %s5560_s20, %s5399_s23  ;;  %p5405_p13 = scmp.lt.s32.totalorder %s5399_s23, %s5399_s23 }
  0x1e   :  { %p5406_p0 = por %p5405_p13, %p5404_p12 }
  0x20   :  { %p5407_p1 = pnand %p5406_p0, %p5400_p11 }
  0x22   :  { %5410 = shalt.err (!%p5407_p1)
}
  0x23   :  { %35 = dma.hbm_to_vmem [thread:$0]  %s6291_s2, 256, %s5560_s20, [#allocation3], %s5487_s29, %s5487_s29, %s5488_s30  }
  0x24   :  { %s5489_s24 = smov [#allocation7]   ;;  %s5490_s26 = smov [#allocation8]  }
  0x25   :  { %s57_s25 = sshll.u32 %s5489_s24, 4  ;;  %s69_s27 = sshll.u32 %s5490_s26, 4  ;;  %s58_s25 = int_to_ptr.vmem [resolvable:$true] %s57_s25  ;;  %s5597_s27 = int_to_ptr.vmem [resolvable:$true] %s69_s27 }
  0x26   :  { %s5411_s13 = scalar_lea.hbm %s6295_s6, 6144 }
  0x27   :  { %p5412_p2 = scmp.ne.s32.totalorder %s6295_s6, %s5411_s13  ;;  %p5415_p3 = scmp.lt.u32.totalorder %s5411_s13, %s6295_s6 }
  0x29   :  { %p5417_p4 = pnand %p5415_p3, %p5412_p2 }
  0x2b   :  { %5420 = shalt.err (!%p5417_p4)
}
  0x2c   :  { %s5421_s2 = scalar_lea.vmem %s58_s25, 6144  ;;  %p5426_p6 = scmp.lt.s32.totalorder %s58_s25, %s58_s25 }
  0x2d   :  { %p5422_p5 = scmp.ne.s32.totalorder %s58_s25, %s5421_s2  ;;  %p5427_p7 = scmp.lt.s32.totalorder %s5421_s2, %s5421_s2 }
  0x2f   :  { %p5428_p8 = por %p5427_p7, %p5426_p6 }
  0x31   :  { %p5429_p9 = pnand %p5428_p8, %p5422_p5 }
  0x33   :  { %5432 = shalt.err (!%p5429_p9)
}
  0x34   :  { %63 = dma.hbm_to_vmem [thread:$0]  %s6295_s6, 6144, %s58_s25, [#allocation6], %s5487_s29, %s5487_s29, %s5488_s30  }
  0x35   :  { %s5433_s23 = scalar_lea.hbm %s6296_s7, 384 }
  0x36   :  { %p5434_p10 = scmp.ne.s32.totalorder %s6296_s7, %s5433_s23  ;;  %p5437_p11 = scmp.lt.u32.totalorder %s5433_s23, %s6296_s7 }
  0x38   :  { %p5439_p12 = pnand %p5437_p11, %p5434_p10 }
  0x3a   :  { %5442 = shalt.err (!%p5439_p12)
}
  0x3b   :  { %s5443_s28 = scalar_lea.vmem %s5597_s27, 384  ;;  %p5448_p0 = scmp.lt.s32.totalorder %s5597_s27, %s5597_s27 }
  0x3c   :  { %p5444_p13 = scmp.ne.s32.totalorder %s5597_s27, %s5443_s28  ;;  %p5449_p1 = scmp.lt.s32.totalorder %s5443_s28, %s5443_s28 }
  0x3e   :  { %p5450_p2 = por %p5449_p1, %p5448_p0 }
  0x40   :  { %p5451_p3 = pnand %p5450_p2, %p5444_p13 }
  0x42   :  { %5454 = shalt.err (!%p5451_p3)
}
  0x43   :  { %75 = dma.hbm_to_vmem [thread:$0]  %s6296_s7, 384, %s5597_s27, [#allocation9], %s5487_s29, %s5487_s29, %s5488_s30  }
  0x44   :  { %5477 = dma.done.wait [#allocation3], 256  }
  0x45   :  { %5478 = vsyncadd [#allocation3], 4294967040 }
  0x46   :  { %5479 = dma.done.wait [#allocation6], 6400  }
  0x47   :  { %5480 = vsyncadd [#allocation6], 4294960896 }
  0x48   :  { %5481 = dma.done.wait [#allocation9], 384  }
  0x49   :  { %5482 = vsyncadd [#allocation9], 4294966912  ;;  %v103_v0 = vld [vmem:[#allocation7] sm:$0xff]  ;;  %v104_v1 = vld [vmem:[#allocation7 + $0x8] sm:$0xff]  ;;  %vm111_vm0 = vcmask 261120   ;;  %v107_v24 = vlaneseq  ;;  %vm367_vm1 = vcmask 64512  }
  0x4a   :  { %v105_v2 = vld [vmem:[#allocation7 + $0x10] sm:$0xff]  ;;  %v4910_v3 = vpack.c.bf16 %v104_v1, %v103_v0  ;;  %v106_v4 = vld [vmem:[#allocation7 + $0x18] sm:$0xff]  ;;  %v5637_v5 = vld [vmem:[%s6289_s0] sm:$0xff]  ;;  %s5492_s2 = smov 120   ;;  %s5493_s20 = smov 112   ;;  %vm871_vm4 = vcmask 130048  }
  0x4b   :  { %v5642_v6 = vld [vmem:[%s6290_s1] sm:$0xff]  ;;  %v4914_v7 = vpack.c.bf16 %v106_v4, %v105_v2  ;;  %4582 = vmatprep.mubr.msk.f32.mxu0 %vm111_vm0, %v5637_v5  ;;  %v195_v10 = vld [vmem:[#allocation7 + $0x28] sm:$0xff]  ;;  %v196_v14 = vld [vmem:[#allocation7 + $0x30] sm:$0xff]  ;;  %v5667_v25 = vshrl.u32 %v107_v24, 7  ;;  %v746_v4 = vand.u32 127, %v107_v24  ;;  %s5494_s19 = smov 16  }
  0x4c   :  { %v101_v8 = vadd.f32 %v5642_v6, %v5637_v5  ;;  %v194_v9 = vld [vmem:[#allocation7 + $0x20] sm:$0xff]  ;;  %4911 = vmatprep.subr.bf16.mxu1 %v4910_v3  ;;  %v5652_v11 = vld [vmem:[%s6289_s0 + $0x8] sm:$0xff]  ;;  %v197_v15 = vld [vmem:[#allocation7 + $0x38] sm:$0xff]  ;;  %s5491_s0 = smov 104   ;;  %s5495_s21 = smov 24   ;;  %vm1332_vm12 = vcmask 195584  }
  0x4d   :  { %4913 = vmatpush3.bf16.msra.mxu1 %v4910_v3  ;;  %v5657_v12 = vld [vmem:[%s6290_s1 + $0x8] sm:$0xff]  ;;  %v4918_v13 = vpack.c.bf16 %v195_v10, %v194_v9  ;;  %v4922_v17 = vpack.c.bf16 %v197_v15, %v196_v14  ;;  %v278_v18 = vld [vmem:[#allocation7 + $0x40] sm:$0xff]  ;;  %v280_v20 = vld [vmem:[#allocation7 + $0x50] sm:$0xff]  ;;  %v5670_v26 = vsub.s32 0, %v5667_v25  ;;  %v5677_v31 = vsub.s32 1, %v5667_v25 }
  0x4e   :  { %4560 = vmatprep.mubr.msk.f32.mxu1 %vm111_vm0, %v101_v8  ;;  %4915 = vmatprep.subr.bf16.mxu1 %v4914_v7  ;;  %v102_v16 = vadd.f32 %v5657_v12, %v5652_v11  ;;  %v279_v19 = vld [vmem:[#allocation7 + $0x48] sm:$0xff]  ;;  %v281_v22 = vld [vmem:[#allocation7 + $0x58] sm:$0xff]  ;;  %v5672_v27 = vld [vmem:[#allocation8] sm:$0xff]  ;;  %v5703_v42 = vsub.s32 2, %v5667_v25  ;;  %v738_v3 = vadd.s32 8, %v5667_v25  ;;  %v751_v9 = vand.u32 1, %v5667_v25 }
  0x4f   :  { %v4926_v21 = vpack.c.bf16 %v279_v19, %v278_v18  ;;  %v4930_v23 = vpack.c.bf16 %v281_v22, %v280_v20  ;;  %v110_v28 = vrot.slane %v5672_v27, %v5670_v26  ;;  %v201_v33 = vrot.slane %v5672_v27, %v5677_v31  ;;  %vm5684_vm2 = vmpackc.low %vm367_vm1, %vm367_vm1 }
  0x50   :  { %v285_v45 = vrot.slane %v5672_v27, %v5703_v42  ;;  %v740_v22 = vadd.s32 24, %v5667_v25  ;;  %vm5497_vm13 = vmmov 0   ;;  %vm4108_vm14 = vcmask 523264  }
  0x51   :  { %4917 = vmatpush3.bf16.msra.mxu1 %v4914_v7  ;;  %4927 = vmatprep.subr.bf16.mxu0 %v4926_v21  ;;  %v758_v7 = vand.u32 1, %v738_v3 }
  0x52   :  { %4919 = vmatprep.subr.bf16.mxu1 %v4918_v13  ;;  %4929 = vmatpush3.bf16.msra.mxu0 %v4926_v21  ;;  %v772_v24 = vand.u32 1, %v740_v22 }
  0x53   :  { %4931 = vmatprep.subr.bf16.mxu0 %v4930_v23 }
  0x54   :  { %4561 = vmatmul.mubr.msk.f32.vlgmr.msra.gmra.mrb[0].mxu1 %vm111_vm0, %v102_v16 }
  0x55   :  { %4921 = vmatpush3.bf16.msra.mxu1 %v4918_v13  ;;  %4571 = vmatprep.mubr.msk.f32.mxu1 %vm111_vm0, %v101_v8  ;;  %v847_v8 = vand.u32 1, %v746_v4 }
  0x56   :  { %4923 = vmatprep.subr.bf16.mxu1 %v4922_v17  ;;  %4933 = vmatpush3.bf16.msra.mxu0 %v4930_v23  ;;  %v739_v23 = vadd.s32 16, %v5667_v25 }
  0x57   :  { %vm5734_vm3 = vcmp.eq.s32.totalorder %v758_v7, %v847_v8  ;;  %vm5738_vm5 = vcmp.eq.s32.totalorder %v751_v9, %v847_v8  ;;  %vm5752_vm6 = vcmp.eq.s32.totalorder %v772_v24, %v847_v8 }
  0x59   :  { %4925 = vmatpush3.bf16.msra.mxu1 %v4922_v17  ;;  %4583 = vmatmul.mubr.msk.f32.vlgmr.msra.gmra.mrb[0].mxu0 %vm111_vm0, %v5652_v11 }
  0x5c   :  { %4572 = vmatmul.mubr.msk.f32.vlgmr.msra.gmra.mrb[2].mxu1 %vm111_vm0, %v102_v16 }
 0x127   :  { %v4562_v29 = vpop.f32.mrb[0].mxu1 }
 0x128   :  { %v184_v30 = vpop.f32.mrb[1].mxu1  ;;  %v190_v41 = vadd.f32 %v4562_v29, %v110_v28  ;;  %v765_v29 = vand.u32 1, %v739_v23 }
 0x129   :  { %v185_v32 = vadd.f32 %v184_v30, %v110_v28  ;;  %v742_v28 = vadd.s32 40, %v5667_v25  ;;  %v741_v30 = vadd.s32 32, %v5667_v25 }
 0x12a   :  { %vm5757_vm7 = vcmp.eq.s32.totalorder %v765_v29, %v847_v8 }
 0x12b   :  { %4589 = vmatprep.mubr.msk.f32.mxu1 %vm367_vm1, %v185_v32 }
 0x12c   :  { %v4584_v43 = vpop.f32.mrb[0].mxu0 }
 0x12d   :  { %v358_v44 = vpop.f32.mrb[1].mxu0  ;;  %v5707_v53 = vadd.f32 %v4584_v43, %v285_v45 }
 0x12e   :  { %v5709_v54 = vadd.f32 %v358_v44, %v285_v45 }
 0x12f   :  { %v4573_v34 = vpop.f32.mrb[2].mxu1 }
 0x130   :  { %v274_v35 = vadd.f32 %v4573_v34, %v201_v33  ;;  %v268_v36 = vpop.f32.mrb[3].mxu1  ;;  %v4958_v61 = vpack.c.bf16 %v5707_v53, %v5709_v54  ;;  %v786_v34 = vand.u32 1, %v742_v28 }
 0x131   :  { %v269_v37 = vadd.f32 %v268_v36, %v201_v33 }
 0x132   :  { %vm5767_vm8 = vcmp.eq.s32.totalorder %v786_v34, %v847_v8 }
 0x133   :  { %v5171_v38 = vpack.i.bf16 %v274_v35, %v269_v37  ;;  %v4934_v39 = vpack.c.bf16 %v274_v35, %v269_v37  ;;  %v744_v35 = vadd.s32 56, %v5667_v25 }
 0x135   :  { %5172 = vrot.lane.b32.xlu1 %v5171_v38, %s5491_s0  ;;  %5162 = vrot.lane.b32.xlu0 %v5171_v38, %s5492_s2 }
 0x136   :  { %4936 = vmatprep.subr.msk.bf16.mxu1 %vm5684_vm2, %v4934_v39 }
 0x137   :  { %4939 = vmatpush3.bf16.xpose.msk.msra.mxu1 %vm5684_vm2, %v4934_v39  ;;  %v779_v39 = vand.u32 1, %v741_v30 }
 0x139   :  { %5167 = vrot.lane.b32.xlu0 %v5171_v38, %s5493_s20  ;;  %455 = vrot.lane.b32.xlu1 %v185_v32, %s5492_s2  ;;  %vm5772_vm9 = vcmp.eq.s32.totalorder %v779_v39, %v847_v8 }
 0x13d   :  { %457 = vrot.lane.b32.xlu0 %v190_v41, %s5492_s2  ;;  %546 = vrot.lane.b32.xlu1 %v185_v32, %s5493_s20 }
 0x13e   :  { %4590 = vmatmul.mubr.msk.f32.vlgmr.msra.gmra.mrb[4].mxu1 %vm367_vm1, %v190_v41 }
 0x141   :  { %548 = vrot.lane.b32.xlu0 %v190_v41, %s5493_s20  ;;  %637 = vrot.lane.b32.xlu1 %v185_v32, %s5491_s0 }
 0x145   :  { %639 = vrot.lane.b32.xlu0 %v190_v41, %s5491_s0  ;;  %v743_v41 = vadd.s32 48, %v5667_v25 }
 0x1a7   :  { %v5173_v46 = vpop.permute.xlu1 %5172  ;;  %v5163_v47 = vpop.permute.xlu0 %5162 }
 0x1a8   :  { %v5175_v48 = vunpack.i.h.bf16 %v5173_v46  ;;  %v5174_v49 = vunpack.i.l.bf16 %v5173_v46  ;;  %v5165_v50 = vunpack.i.h.bf16 %v5163_v47  ;;  %v5164_v51 = vunpack.i.l.bf16 %v5163_v47 }
 0x1aa   :  { %v4940_v52 = vpack.c.bf16 %v5165_v50, %v5164_v51  ;;  %v4952_v57 = vpack.c.bf16 %v5175_v48, %v5174_v49  ;;  %v800_v49 = vand.u32 1, %v744_v35 }
 0x1ab   :  { %v5168_v55 = vpop.permute.xlu0 %5167  ;;  %v456_v56 = vpop.permute.xlu1 %455 }
 0x1ac   :  { %v5170_v58 = vunpack.i.h.bf16 %v5168_v55  ;;  %v5169_v59 = vunpack.i.l.bf16 %v5168_v55  ;;  %4942 = vmatprep.subr.msk.bf16.mxu0 %vm5684_vm2, %v4940_v52  ;;  %4596 = vmatprep.mubr.msk.f32.mxu0 %vm367_vm1, %v456_v56  ;;  %v793_v56 = vand.u32 1, %v743_v41  ;;  %vm5781_vm10 = vcmp.eq.s32.totalorder %v800_v49, %v847_v8 }
 0x1ad   :  { %4945 = vmatpush3.bf16.xpose.msk.msra.mxu0 %vm5684_vm2, %v4940_v52 }
 0x1ae   :  { %v4946_v60 = vpack.c.bf16 %v5170_v58, %v5169_v59  ;;  %4954 = vmatprep.subr.msk.bf16.mxu0 %vm5684_vm2, %v4952_v57  ;;  %vm5786_vm11 = vcmp.eq.s32.totalorder %v793_v56, %v847_v8 }
 0x1af   :  { %v458_v62 = vpop.permute.xlu0 %457  ;;  %v547_v63 = vpop.permute.xlu1 %546 }
 0x1b0   :  { %4948 = vmatprep.subr.msk.bf16.mxu1 %vm5684_vm2, %v4946_v60  ;;  %4603 = vmatprep.mubr.msk.f32.mxu1 %vm367_vm1, %v547_v63 }
 0x1b1   :  { %4951 = vmatpush3.bf16.xpose.msk.msra.mxu1 %vm5684_vm2, %v4946_v60 }
 0x1b2   :  { %4959 = vmatprep.subr.bf16.mxu1 %v4958_v61 }
 0x1b3   :  { %v638_v0 = vpop.permute.xlu1 %637  ;;  %v549_v1 = vpop.permute.xlu0 %548 }
 0x1b4   :  { %4597 = vmatmul.mubr.msk.f32.vlgmr.msra.gmra.mrb[2].mxu0 %vm367_vm1, %v458_v62 }
 0x1b5   :  { %4957 = vmatpush3.bf16.xpose.msk.msra.mxu0 %vm5684_vm2, %v4952_v57  ;;  %4610 = vmatprep.mubr.msk.f32.mxu0 %vm367_vm1, %v638_v0 }
 0x1b7   :  { %v640_v2 = vpop.permute.xlu0 %639 }
 0x1b8   :  { %4604 = vmatmul.mubr.msk.f32.vlgmr.msra.gmra.mrb[6].mxu1 %vm367_vm1, %v549_v1 }
 0x1b9   :  { %4961 = vmatpush3.bf16.msra.mxu1 %v4958_v61 }
 0x1bc   :  { %4611 = vmatmul.mubr.msk.f32.vlgmr.msra.gmra.mrb[4].mxu0 %vm367_vm1, %v640_v2 }
 0x211   :  { %v4591_v10 = vpop.f32.mrb[4].mxu1 }
 0x212   :  { %v729_v14 = vmul.f32 0.35355338, %v4591_v10  ;;  %v446_v15 = vpop.f32.mrb[5].mxu1 }
 0x213   :  { %v728_v17 = vmul.f32 0.35355338, %v446_v15 }
 0x214   :  { %v864_v18 = vsel %vm5734_vm3, %v729_v14, -1e+30 }
 0x215   :  { %v875_v19 = vsel %vm871_vm4, %v864_v18, -inf  ;;  %v863_v20 = vsel %vm5738_vm5, %v728_v17, -1e+30 }
 0x216   :  { %876 = vmax.xlane.f32.xlu0 %v875_v19  ;;  %v872_v21 = vsel %vm871_vm4, %v863_v20, -inf }
 0x217   :  { %873 = vmax.xlane.f32.xlu1 %v872_v21 }
 0x287   :  { %v4598_v32 = vpop.f32.mrb[2].mxu0 }
 0x288   :  { %v731_v36 = vmul.f32 0.35355338, %v4598_v32  ;;  %v537_v37 = vpop.f32.mrb[3].mxu0 }
 0x289   :  { %v730_v43 = vmul.f32 0.35355338, %v537_v37 }
 0x28a   :  { %v866_v44 = vsel %vm5752_vm6, %v731_v36, -1e+30 }
 0x28b   :  { %v4605_v45 = vpop.f32.mrb[6].mxu1  ;;  %v881_v46 = vsel %vm871_vm4, %v866_v44, -inf  ;;  %v865_v47 = vsel %vm5757_vm7, %v730_v43, -1e+30 }
 0x28c   :  { %v733_v50 = vmul.f32 0.35355338, %v4605_v45  ;;  %882 = vmax.xlane.f32.xlu1 %v881_v46  ;;  %v628_v51 = vpop.f32.mrb[7].mxu1  ;;  %v878_v52 = vsel %vm871_vm4, %v865_v47, -inf }
 0x28d   :  { %v732_v57 = vmul.f32 0.35355338, %v628_v51  ;;  %879 = vmax.xlane.f32.xlu0 %v878_v52 }
 0x28e   :  { %v868_v58 = vsel %vm5767_vm8, %v733_v50, -1e+30 }
 0x28f   :  { %v4612_v59 = vpop.f32.mrb[4].mxu0  ;;  %v887_v60 = vsel %vm871_vm4, %v868_v58, -inf  ;;  %v867_v61 = vsel %vm5772_vm9, %v732_v57, -1e+30 }
 0x290   :  { %v735_v63 = vmul.f32 0.35355338, %v4612_v59  ;;  %v719_v0 = vpop.f32.mrb[5].mxu0  ;;  %888 = vmax.xlane.f32.xlu1 %v887_v60  ;;  %v884_v1 = vsel %vm871_vm4, %v867_v61, -inf }
 0x291   :  { %v734_v3 = vmul.f32 0.35355338, %v719_v0  ;;  %885 = vmax.xlane.f32.xlu0 %v884_v1 }
 0x292   :  { %v870_v4 = vsel %vm5781_vm10, %v735_v63, -1e+30 }
 0x293   :  { %v893_v7 = vsel %vm871_vm4, %v870_v4, -inf  ;;  %v869_v9 = vsel %vm5786_vm11, %v734_v3, -1e+30 }
 0x294   :  { %894 = vmax.xlane.f32.xlu1 %v893_v7  ;;  %v890_v10 = vsel %vm871_vm4, %v869_v9, -inf  ;;  %v5181_v7 = vpack.i.bf16 %v5707_v53, %v5709_v54 }
 0x295   :  { %891 = vmax.xlane.f32.xlu0 %v890_v10 }
 0x2a3   :  { %v877_v14 = vpop.xlane.xlu0 %876 }
 0x2a4   :  { %v897_v15 = vsub.f32 %v864_v18, %v877_v14  ;;  %v874_v8 = vpop.xlane.xlu1 %873 }
 0x2a5   :  { %v896_v17 = vsub.f32 %v863_v20, %v874_v8 }
 0x2a6   :  { %v906_v19 = vmul.f32 1.442695, %v897_v15 }
 0x2a7   :  { %v904_v21 = vmul.f32 1.442695, %v896_v17 }
 0x2a8   :  { %5251 = vpow2.f32 %v906_v19 }
 0x2a9   :  { %5253 = vpow2.f32 %v904_v21 }
 0x2b2   :  { %v5252_v22 = vpop.eup %5251 }
 0x2b3   :  { %v5254_v23 = vpop.eup %5253  ;;  %v923_v24 = vsel %vm871_vm4, %v5252_v22, 0.0 }
 0x2b4   :  { %924 = vadd.xlane.f32.xlu1 %v923_v24  ;;  %v920_v28 = vsel %vm871_vm4, %v5254_v23, 0.0 }
 0x2b5   :  { %921 = vadd.xlane.f32.xlu0 %v920_v28 }
 0x319   :  { %v883_v29 = vpop.xlane.xlu1 %882 }
 0x31a   :  { %v899_v30 = vsub.f32 %v866_v44, %v883_v29  ;;  %v880_v32 = vpop.xlane.xlu0 %879 }
 0x31b   :  { %v898_v34 = vsub.f32 %v865_v47, %v880_v32 }
 0x31c   :  { %v910_v35 = vmul.f32 1.442695, %v899_v30 }
 0x31d   :  { %v908_v18 = vmul.f32 1.442695, %v898_v34  ;;  %v889_v36 = vpop.xlane.xlu1 %888 }
 0x31e   :  { %5255 = vpow2.f32 %v910_v35  ;;  %v901_v20 = vsub.f32 %v868_v58, %v889_v36  ;;  %v886_v37 = vpop.xlane.xlu0 %885 }
 0x31f   :  { %5257 = vpow2.f32 %v908_v18  ;;  %v900_v39 = vsub.f32 %v867_v61, %v886_v37 }
 0x320   :  { %v914_v41 = vmul.f32 1.442695, %v901_v20 }
 0x321   :  { %v912_v43 = vmul.f32 1.442695, %v900_v39  ;;  %v895_v45 = vpop.xlane.xlu1 %894 }
 0x322   :  { %5259 = vpow2.f32 %v914_v41  ;;  %v903_v46 = vsub.f32 %v870_v4, %v895_v45  ;;  %v892_v49 = vpop.xlane.xlu0 %891 }
 0x323   :  { %5261 = vpow2.f32 %v912_v43  ;;  %v902_v50 = vsub.f32 %v869_v9, %v892_v49 }
 0x324   :  { %v918_v51 = vmul.f32 1.442695, %v903_v46 }
 0x325   :  { %v916_v44 = vmul.f32 1.442695, %v902_v50 }
 0x326   :  { %5263 = vpow2.f32 %v918_v51 }
 0x327   :  { %5265 = vpow2.f32 %v916_v44 }
 0x328   :  { %v5798_v47 = vpop.eup %5255 }
 0x329   :  { %v5258_v52 = vpop.eup %5257  ;;  %v929_v56 = vsel %vm871_vm4, %v5798_v47, 0.0 }
 0x32a   :  { %930 = vadd.xlane.f32.xlu1 %v929_v56  ;;  %v926_v57 = vsel %vm871_vm4, %v5258_v52, 0.0 }
 0x32b   :  { %927 = vadd.xlane.f32.xlu0 %v926_v57 }
 0x32c   :  { %v5260_v58 = vpop.eup %5259 }
 0x32d   :  { %v5262_v59 = vpop.eup %5261  ;;  %v935_v60 = vsel %vm871_vm4, %v5260_v58, 0.0 }
 0x32e   :  { %936 = vadd.xlane.f32.xlu1 %v935_v60  ;;  %v932_v61 = vsel %vm871_vm4, %v5262_v59, 0.0 }
 0x32f   :  { %933 = vadd.xlane.f32.xlu0 %v932_v61  ;;  %v1337_v61 = vld [vmem:[#allocation7 + $0x68] sm:$0xff] }
 0x330   :  { %v5805_v63 = vpop.eup %5263 }
 0x331   :  { %v5266_v0 = vpop.eup %5265  ;;  %v941_v1 = vsel %vm871_vm4, %v5805_v63, 0.0 }
 0x332   :  { %942 = vadd.xlane.f32.xlu1 %v941_v1  ;;  %v938_v3 = vsel %vm871_vm4, %v5266_v0, 0.0 }
 0x333   :  { %939 = vadd.xlane.f32.xlu0 %v938_v3  ;;  %v1339_v3 = vld [vmem:[#allocation7 + $0x78] sm:$0xff] }
 0x341   :  { %v925_v4 = vpop.xlane.xlu1 %924 }
 0x342   :  { %5267 = vrcp.f32 %v925_v4  ;;  %v922_v9 = vpop.xlane.xlu0 %921 }
 0x343   :  { %5269 = vrcp.f32 %v922_v9  ;;  %5182 = vrot.lane.b32.xlu1 %v5181_v7, %s5493_s20 }
 0x347   :  { %5187 = vrot.lane.b32.xlu1 %v5181_v7, %s5491_s0 }
 0x349   :  { %5177 = vrot.lane.b32.xlu0 %v5181_v7, %s5492_s2 }
 0x34c   :  { %v5268_v10 = vpop.eup %5267 }
 0x34d   :  { %v5270_v14 = vpop.eup %5269  ;;  %v947_v8 = vmul.f32 %v5268_v10, %v5252_v22 }
 0x34e   :  { %v945_v15 = vmul.f32 %v5270_v14, %v5254_v23 }
 0x350   :  { %4617 = vmatprep.mubr.msk.f32.mxu1 %vm871_vm4, %v945_v15 }
 0x351   :  { %4618 = vmatmul.mubr.msk.f32.vlgmr.msra.gmra.mrb[8].mxu1 %vm871_vm4, %v947_v8 }
 0x3b7   :  { %v931_v17 = vpop.xlane.xlu1 %930 }
 0x3b8   :  { %v928_v19 = vpop.xlane.xlu0 %927 }
 0x3b9   :  { %5271 = vrcp.f32 %v928_v19 }
 0x3bb   :  { %v937_v53 = vpop.xlane.xlu1 %936 }
 0x3bc   :  { %5273 = vrcp.f32 %v937_v53  ;;  %v934_v54 = vpop.xlane.xlu0 %933 }
 0x3bd   :  { %5275 = vrcp.f32 %v934_v54 }
 0x3be   :  { %5277 = vrcp.f32 %v931_v17 }
 0x3bf   :  { %v943_v21 = vpop.xlane.xlu1 %942 }
 0x3c0   :  { %v940_v24 = vpop.xlane.xlu0 %939 }
 0x3c1   :  { %5279 = vrcp.f32 %v940_v24 }
 0x3c2   :  { %5281 = vrcp.f32 %v943_v21 }
 0x3c3   :  { %v5272_v28 = vpop.eup %5271  ;;  %v5183_v29 = vpop.permute.xlu1 %5182 }
 0x3c4   :  { %v5185_v23 = vunpack.i.h.bf16 %v5183_v29  ;;  %v5184_v22 = vunpack.i.l.bf16 %v5183_v29  ;;  %v5178_v30 = vpop.permute.xlu0 %5177  ;;  %v949_v32 = vmul.f32 %v5272_v28, %v5258_v52 }
 0x3c5   :  { %v5180_v34 = vunpack.i.h.bf16 %v5178_v30  ;;  %v5179_v35 = vunpack.i.l.bf16 %v5178_v30  ;;  %v5840_v30 = vsub.s32 3, %v5667_v25 }
 0x3c6   :  { %v5274_v18 = vpop.eup %5273  ;;  %v4966_v36 = vpack.c.bf16 %v5185_v23, %v5184_v22  ;;  %4624 = vmatprep.mubr.msk.f32.mxu1 %vm871_vm4, %v949_v32 }
 0x3c7   :  { %v5276_v20 = vpop.eup %5275  ;;  %v5188_v37 = vpop.permute.xlu1 %5187  ;;  %v4962_v39 = vpack.c.bf16 %v5180_v34, %v5179_v35  ;;  %v955_v50 = vmul.f32 %v5274_v18, %v5260_v58  ;;  %v1336_v58 = vld [vmem:[#allocation7 + $0x60] sm:$0xff]  ;;  %v1343_v32 = vrot.slane %v5672_v27, %v5840_v30 }
 0x3c8   :  { %v5278_v41 = vpop.eup %5277  ;;  %v5190_v43 = vunpack.i.h.bf16 %v5188_v37  ;;  %v5189_v45 = vunpack.i.l.bf16 %v5188_v37  ;;  %4967 = vmatprep.subr.bf16.mxu0 %v4966_v36  ;;  %v953_v46 = vmul.f32 %v5276_v20, %v5262_v59  ;;  %v4974_v1 = vpack.c.bf16 %v1337_v61, %v1336_v58  ;;  %v1568_v58 = vld [vmem:[#allocation7 + $0xb8] sm:$0xff] }
 0x3c9   :  { %4963 = vmatprep.subr.bf16.mxu1 %v4962_v39  ;;  %4969 = vmatpush3.bf16.msra.mxu0 %v4966_v36  ;;  %v951_v44 = vmul.f32 %v5278_v41, %v5798_v47  ;;  %v1338_v47 = vld [vmem:[#allocation7 + $0x70] sm:$0xff] }
 0x3ca   :  { %v4970_v49 = vpack.c.bf16 %v5190_v43, %v5189_v45  ;;  %4965 = vmatpush3.bf16.msra.mxu1 %v4962_v39  ;;  %4631 = vmatprep.mubr.msk.f32.mxu0 %vm871_vm4, %v953_v46  ;;  %v4978_v4 = vpack.c.bf16 %v1339_v3, %v1338_v47  ;;  %v1470_v47 = vld [vmem:[#allocation5] sm:$0xff] }
 0x3cb   :  { %v5280_v51 = vpop.eup %5279  ;;  %4975 = vmatprep.subr.bf16.mxu0 %v4974_v1 }
 0x3cc   :  { %v5282_v52 = vpop.eup %5281  ;;  %4632 = vmatmul.mubr.msk.f32.vlgmr.msra.gmra.mrb[6].mxu0 %vm871_vm4, %v955_v50  ;;  %4971 = vmatprep.subr.bf16.mxu1 %v4970_v49  ;;  %v957_v56 = vmul.f32 %v5280_v51, %v5266_v0 }
 0x3cd   :  { %4625 = vmatmul.mubr.msk.f32.vlgmr.msra.gmra.mrb[10].mxu1 %vm871_vm4, %v951_v44  ;;  %v959_v57 = vmul.f32 %v5282_v52, %v5805_v63  ;;  %4977 = vmatpush3.bf16.msra.mxu0 %v4974_v1  ;;  %v1466_v1 = vld [vmem:[#allocation2] sm:$0xff] }
 0x3ce   :  { %4973 = vmatpush3.bf16.msra.mxu1 %v4970_v49  ;;  %4638 = vmatprep.mubr.msk.f32.mxu1 %vm871_vm4, %v957_v56  ;;  %v1472_v3 = vadd.f32 %v1470_v47, %v1466_v1 }
 0x3cf   :  { %4979 = vmatprep.subr.bf16.mxu0 %v4978_v4 }
 0x3d1   :  { %4639 = vmatmul.mubr.msk.f32.vlgmr.msra.gmra.mrb[12].mxu1 %vm871_vm4, %v959_v57  ;;  %4981 = vmatpush3.bf16.msra.mxu0 %v4978_v4  ;;  %v1566_v57 = vld [vmem:[#allocation7 + $0xa8] sm:$0xff] }
 0x3d2   :  { %v5850_v4 = vld [vmem:[#allocation2 + $0x8] sm:$0xff] }
 0x424   :  { %v4619_v59 = vpop.f32.mrb[8].mxu1 }
 0x425   :  { %v1032_v60 = vpop.f32.mrb[9].mxu1 }
 0x49f   :  { %v4633_v0 = vpop.f32.mrb[6].mxu0 }
 0x4a0   :  { %v4626_v7 = vpop.f32.mrb[10].mxu1  ;;  %v1208_v9 = vpop.f32.mrb[7].mxu0 }
 0x4a1   :  { %1308 = vrot.lane.b32.xlu1 %v4626_v7, %s5488_s30  ;;  %v1121_v63 = vpop.f32.mrb[11].mxu1 }
 0x4a2   :  { %1306 = vrot.lane.b32.xlu0 %v1121_v63, %s5488_s30  ;;  %v1476_v63 = vld [vmem:[#allocation7 + $0x88] sm:$0xff] }
 0x4a4   :  { %v4640_v10 = vpop.f32.mrb[12].mxu1 }
 0x4a5   :  { %1316 = vrot.lane.b32.xlu1 %v4633_v0, %s5494_s19  ;;  %v1295_v14 = vpop.f32.mrb[13].mxu1  ;;  %v1471_v0 = vld [vmem:[#allocation5 + $0x8] sm:$0xff] }
 0x4a6   :  { %1314 = vrot.lane.b32.xlu0 %v1208_v9, %s5494_s19  ;;  %v1473_v7 = vadd.f32 %v1471_v0, %v5850_v4  ;;  %v1475_v9 = vld [vmem:[#allocation7 + $0x80] sm:$0xff] }
 0x4a9   :  { %1324 = vrot.lane.b32.xlu1 %v4640_v10, %s5495_s21  ;;  %v4982_v10 = vpack.c.bf16 %v1476_v63, %v1475_v9 }
 0x4aa   :  { %1322 = vrot.lane.b32.xlu0 %v1295_v14, %s5495_s21  ;;  %v1477_v14 = vld [vmem:[#allocation7 + $0x90] sm:$0xff] }
 0x4ab   :  { %4983 = vmatprep.subr.bf16.mxu1 %v4982_v10 }
 0x4ac   :  { %4985 = vmatpush3.bf16.msra.mxu1 %v4982_v10 }
 0x513   :  { %v1309_v15 = vpop.permute.xlu1 %1308 }
 0x514   :  { %v1307_v8 = vpop.permute.xlu0 %1306  ;;  %v1329_v21 = vsel %vm367_vm1, %v4619_v59, %v1309_v15  ;;  %v1478_v15 = vld [vmem:[#allocation7 + $0x98] sm:$0xff] }
 0x515   :  { %v1328_v53 = vsel %vm367_vm1, %v1032_v60, %v1307_v8  ;;  %v1567_v60 = vld [vmem:[#allocation7 + $0xb0] sm:$0xff]  ;;  %v4986_v8 = vpack.c.bf16 %v1478_v15, %v1477_v14 }
 0x516   :  { %v4994_v61 = vpack.c.bf16 %v1568_v58, %v1567_v60 }
 0x517   :  { %v1317_v17 = vpop.permute.xlu1 %1316  ;;  %4987 = vmatprep.subr.bf16.mxu1 %v4986_v8 }
 0x518   :  { %v1315_v19 = vpop.permute.xlu0 %1314  ;;  %v1331_v29 = vsel %vm871_vm4, %v1329_v21, %v1317_v17  ;;  %4989 = vmatpush3.bf16.msra.mxu1 %v4986_v8 }
 0x519   :  { %v1330_v24 = vsel %vm871_vm4, %v1328_v53, %v1315_v19 }
 0x51b   :  { %v1325_v54 = vpop.permute.xlu1 %1324 }
 0x51c   :  { %v1323_v28 = vpop.permute.xlu0 %1322  ;;  %v1334_v22 = vsel %vm1332_vm12, %v1331_v29, %v1325_v54  ;;  %v5858_v29 = vld [vmem:[#allocation8 + $0x8] sm:$0xff] }
 0x51d   :  { %v1333_v23 = vsel %vm1332_vm12, %v1330_v24, %v1323_v28  ;;  %v5856_v28 = vsub.s32 4, %v5667_v25 }
 0x51e   :  { %4649 = vmatprep.mubr.msk.f32.mxu0 %vm111_vm0, %v1333_v23  ;;  %v1462_v23 = vsub.s32 5, %v5667_v25 }
 0x51f   :  { %4650 = vmatmul.mubr.msk.f32.vlgmr.msra.gmra.mrb[8].mxu0 %vm111_vm0, %v1334_v22  ;;  %v1457_v22 = vrot.slane %v5858_v29, %v5856_v28  ;;  %v1482_v14 = vrot.slane %v5672_v27, %v5856_v28 }
 0x520   :  { %4671 = vmatprep.mubr.msk.f32.mxu0 %vm111_vm0, %v1472_v3 }
 0x5f2   :  { %v4651_v34 = vpop.f32.mrb[8].mxu0 }
 0x5f3   :  { %v1422_v35 = vadd.f32 %v4651_v34, %v1343_v32  ;;  %v1416_v18 = vpop.f32.mrb[9].mxu0 }
 0x5f4   :  { %v1417_v36 = vadd.f32 %v1416_v18, %v1343_v32 }
 0x5f5   :  { %v1426_v20 = vadd.f32 %v1422_v35, %v5652_v11  ;;  %v1463_v35 = vrot.slane %v5858_v29, %v1462_v23 }
 0x5f6   :  { %v1425_v37 = vadd.f32 %v1417_v36, %v5637_v5  ;;  %v1565_v5 = vld [vmem:[#allocation7 + $0xa0] sm:$0xff] }
 0x5f7   :  { %v1430_v39 = vsel %vm111_vm0, %v1426_v20, 0.0  ;;  %v4990_v59 = vpack.c.bf16 %v1566_v57, %v1565_v5  ;;  %v1658_v57 = vld [vmem:[#allocation7 + $0xd8] sm:$0xff] }
 0x5f8   :  { %1431 = vadd.xlane.f32.xlu1 %v1430_v39  ;;  %v1427_v41 = vsel %vm111_vm0, %v1425_v37, 0.0 }
 0x5f9   :  { %1428 = vadd.xlane.f32.xlu0 %v1427_v41  ;;  %4991 = vmatprep.subr.bf16.mxu0 %v4990_v59 }
 0x5fa   :  { %4993 = vmatpush3.bf16.msra.mxu0 %v4990_v59 }
 0x5fb   :  { %4995 = vmatprep.subr.bf16.mxu0 %v4994_v61 }
 0x5fe   :  { %4997 = vmatpush3.bf16.msra.mxu0 %v4994_v61 }
 0x601   :  { %4672 = vmatmul.mubr.msk.f32.vlgmr.msra.gmra.mrb[10].mxu0 %vm111_vm0, %v1473_v7 }
 0x685   :  { %v1432_v43 = vpop.xlane.xlu1 %1431 }
 0x686   :  { %v1435_v45 = vmul.f32 0.03125, %v1432_v43  ;;  %v1429_v46 = vpop.xlane.xlu0 %1428 }
 0x687   :  { %v1434_v49 = vmul.f32 0.03125, %v1429_v46  ;;  %v1572_v46 = vrot.slane %v5672_v27, %v1462_v23 }
 0x688   :  { %v1437_v50 = vsub.f32 %v1426_v20, %v1435_v45 }
 0x689   :  { %v1436_v51 = vsub.f32 %v1425_v37, %v1434_v49 }
 0x68a   :  { %v1439_v56 = vmul.f32 %v1437_v50, %v1437_v50 }
 0x68b   :  { %v1438_v44 = vmul.f32 %v1436_v51, %v1436_v51 }
 0x68c   :  { %v1443_v11 = vsel %vm111_vm0, %v1439_v56, 0.0 }
 0x68d   :  { %v1440_v52 = vsel %vm111_vm0, %v1438_v44, 0.0 }
 0x68e   :  { %1441 = vadd.xlane.f32.xlu0 %v1440_v52 }
 0x692   :  { %1444 = vadd.xlane.f32.xlu0 %v1443_v11  ;;  %v1657_v11 = vld [vmem:[#allocation7 + $0xd0] sm:$0xff] }
 0x693   :  { %v5002_v59 = vpack.c.bf16 %v1658_v57, %v1657_v11 }
 0x6d4   :  { %v4673_v49 = vpop.f32.mrb[10].mxu0 }
 0x71b   :  { %v1442_v17 = vpop.xlane.xlu0 %1441 }
 0x71c   :  { %v1446_v19 = vmul.f32 0.03125, %v1442_v17 }
 0x71e   :  { %v1448_v53 = vadd.f32 1e-05, %v1446_v19 }
 0x71f   :  { %v1445_v54 = vpop.xlane.xlu0 %1444 }
 0x720   :  { %5283 = vrsqrt.f32 %v1448_v53  ;;  %v1447_v21 = vmul.f32 0.03125, %v1445_v54  ;;  %v1661_v53 = vsub.s32 6, %v5667_v25 }
 0x722   :  { %v1449_v24 = vadd.f32 1e-05, %v1447_v21  ;;  %v1662_v54 = vrot.slane %v5672_v27, %v1661_v53 }
 0x724   :  { %5285 = vrsqrt.f32 %v1449_v24 }
 0x72a   :  { %v5284_v32 = vpop.eup %5283 }
 0x72b   :  { %v1452_v34 = vmul.f32 %v5284_v32, %v1436_v51  ;;  %v1645_v51 = vpop.f32.mrb[11].mxu0 }
 0x72c   :  { %v1646_v44 = vadd.f32 %v1645_v51, %v1572_v46 }
 0x72d   :  { %v1458_v18 = vmul.f32 %v1457_v22, %v1452_v34 }
 0x72e   :  { %v5286_v36 = vpop.eup %5285 }
 0x72f   :  { %v1453_v20 = vmul.f32 %v5286_v36, %v1437_v50  ;;  %v5864_v37 = vadd.f32 %v1463_v35, %v1458_v18  ;;  %v1651_v50 = vadd.f32 %v4673_v49, %v1572_v46 }
 0x731   :  { %v1459_v39 = vmul.f32 %v1457_v22, %v1453_v20  ;;  %v1468_v41 = vadd.f32 %v5864_v37, %v5642_v6  ;;  %v5191_v52 = vpack.i.bf16 %v1651_v50, %v1646_v44  ;;  %v5006_v56 = vpack.c.bf16 %v1651_v50, %v1646_v44  ;;  %v1655_v6 = vld [vmem:[#allocation7 + $0xc0] sm:$0xff] }
 0x733   :  { %v5868_v43 = vadd.f32 %v1463_v35, %v1459_v39  ;;  %4660 = vmatprep.mubr.msk.f32.mxu1 %vm111_vm0, %v1468_v41  ;;  %5192 = vrot.lane.b32.xlu1 %v5191_v52, %s5492_s2 }
 0x734   :  { %5008 = vmatprep.subr.msk.bf16.mxu0 %vm5684_vm2, %v5006_v56  ;;  %5197 = vrot.lane.b32.xlu0 %v5191_v52, %s5493_s20 }
 0x735   :  { %v1469_v45 = vadd.f32 %v5868_v43, %v5657_v12  ;;  %5011 = vmatpush3.bf16.xpose.msk.msra.mxu0 %vm5684_vm2, %v5006_v56  ;;  %v1656_v12 = vld [vmem:[#allocation7 + $0xc8] sm:$0xff] }
 0x736   :  { %v4998_v5 = vpack.c.bf16 %v1656_v12, %v1655_v6 }
 0x737   :  { %4661 = vmatmul.mubr.msk.f32.vlgmr.msra.gmra.mrb[14].mxu1 %vm111_vm0, %v1469_v45  ;;  %5202 = vrot.lane.b32.xlu1 %v5191_v52, %s5491_s0 }
 0x738   :  { %4682 = vmatprep.mubr.msk.f32.mxu1 %vm111_vm0, %v1466_v1  ;;  %4999 = vmatprep.subr.bf16.mxu1 %v4998_v5 }
 0x739   :  { %5001 = vmatpush3.bf16.msra.mxu1 %v4998_v5 }
 0x73a   :  { %5003 = vmatprep.subr.bf16.mxu1 %v5002_v59 }
 0x73d   :  { %5005 = vmatpush3.bf16.msra.mxu1 %v5002_v59 }
 0x740   :  { %4683 = vmatmul.mubr.msk.f32.vlgmr.msra.gmra.mrb[16].mxu1 %vm111_vm0, %v5850_v4 }
 0x7a5   :  { %v5193_v60 = vpop.permute.xlu1 %5192 }
 0x7a6   :  { %v5195_v58 = vunpack.i.h.bf16 %v5193_v60  ;;  %v5194_v61 = vunpack.i.l.bf16 %v5193_v60  ;;  %v5198_v1 = vpop.permute.xlu0 %5197 }
 0x7a7   :  { %v5200_v47 = vunpack.i.h.bf16 %v5198_v1  ;;  %v5199_v3 = vunpack.i.l.bf16 %v5198_v1 }
 0x7a8   :  { %v5012_v0 = vpack.c.bf16 %v5195_v58, %v5194_v61 }
 0x7a9   :  { %v5018_v7 = vpack.c.bf16 %v5200_v47, %v5199_v3  ;;  %v5203_v9 = vpop.permute.xlu1 %5202 }
 0x7aa   :  { %v5205_v63 = vunpack.i.h.bf16 %v5203_v9  ;;  %v5204_v10 = vunpack.i.l.bf16 %v5203_v9  ;;  %5014 = vmatprep.subr.msk.bf16.mxu1 %vm5684_vm2, %v5012_v0 }
 0x7ab   :  { %5017 = vmatpush3.bf16.xpose.msk.msra.mxu1 %vm5684_vm2, %v5012_v0  ;;  %5020 = vmatprep.subr.msk.bf16.mxu0 %vm5684_vm2, %v5018_v7 }
 0x7ac   :  { %v5024_v4 = vpack.c.bf16 %v5205_v63, %v5204_v10 }
 0x7ae   :  { %5026 = vmatprep.subr.msk.bf16.mxu1 %vm5684_vm2, %v5024_v4 }
 0x80a   :  { %v4662_v15 = vpop.f32.mrb[14].mxu1 }
 0x80b   :  { %v1561_v8 = vadd.f32 %v4662_v15, %v1482_v14  ;;  %v1555_v17 = vpop.f32.mrb[15].mxu1 }
 0x80c   :  { %v1556_v19 = vadd.f32 %v1555_v17, %v1482_v14 }
 0x80d   :  { %1833 = vrot.lane.b32.xlu0 %v1561_v8, %s5492_s2 }
 0x80e   :  { %1831 = vrot.lane.b32.xlu1 %v1556_v19, %s5492_s2  ;;  %4689 = vmatprep.mubr.msk.f32.mxu0 %vm367_vm1, %v1556_v19 }
 0x80f   :  { %4690 = vmatmul.mubr.msk.f32.vlgmr.msra.gmra.mrb[12].mxu0 %vm367_vm1, %v1561_v8 }
 0x810   :  { %5023 = vmatpush3.bf16.xpose.msk.msra.mxu0 %vm5684_vm2, %v5018_v7 }
 0x811   :  { %1924 = vrot.lane.b32.xlu0 %v1561_v8, %s5493_s20 }
 0x812   :  { %1922 = vrot.lane.b32.xlu1 %v1556_v19, %s5493_s20 }
 0x813   :  { %v4684_v21 = vpop.f32.mrb[16].mxu1 }
 0x814   :  { %v5909_v24 = vadd.f32 %v4684_v21, %v1662_v54  ;;  %v1735_v23 = vpop.f32.mrb[17].mxu1 }
 0x815   :  { %2015 = vrot.lane.b32.xlu0 %v1561_v8, %s5491_s0  ;;  %v5911_v22 = vadd.f32 %v1735_v23, %v1662_v54 }
 0x816   :  { %2013 = vrot.lane.b32.xlu1 %v1556_v19, %s5491_s0 }
 0x817   :  { %v5030_v32 = vpack.c.bf16 %v5909_v24, %v5911_v22 }
 0x819   :  { %5031 = vmatprep.subr.bf16.mxu0 %v5030_v32 }
 0x87f   :  { %v1834_v34 = vpop.permute.xlu0 %1833 }
 0x880   :  { %v1832_v35 = vpop.permute.xlu1 %1831 }
 0x881   :  { %4696 = vmatprep.mubr.msk.f32.mxu1 %vm367_vm1, %v1832_v35 }
 0x882   :  { %4697 = vmatmul.mubr.msk.f32.vlgmr.msra.gmra.mrb[18].mxu1 %vm367_vm1, %v1834_v34 }
 0x883   :  { %5029 = vmatpush3.bf16.xpose.msk.msra.mxu1 %vm5684_vm2, %v5024_v4  ;;  %v1925_v27 = vpop.permute.xlu0 %1924 }
 0x884   :  { %v1923_v18 = vpop.permute.xlu1 %1922 }
 0x885   :  { %4703 = vmatprep.mubr.msk.f32.mxu0 %vm367_vm1, %v1923_v18 }
 0x886   :  { %4704 = vmatmul.mubr.msk.f32.vlgmr.msra.gmra.mrb[14].mxu0 %vm367_vm1, %v1925_v27 }
 0x887   :  { %5033 = vmatpush3.bf16.msra.mxu0 %v5030_v32  ;;  %v2016_v20 = vpop.permute.xlu0 %2015 }
 0x888   :  { %v2014_v36 = vpop.permute.xlu1 %2013 }
 0x889   :  { %4710 = vmatprep.mubr.msk.f32.mxu1 %vm367_vm1, %v2014_v36 }
 0x88a   :  { %4711 = vmatmul.mubr.msk.f32.vlgmr.msra.gmra.mrb[20].mxu1 %vm367_vm1, %v2016_v20 }
 0x8e2   :  { %v4691_v39 = vpop.f32.mrb[12].mxu0 }
 0x8e3   :  { %v2105_v41 = vmul.f32 0.35355338, %v4691_v39  ;;  %v1822_v45 = vpop.f32.mrb[13].mxu0 }
 0x8e4   :  { %v2104_v46 = vmul.f32 0.35355338, %v1822_v45 }
 0x8e5   :  { %v2113_v49 = vsel %vm5734_vm3, %v2105_v41, -1e+30 }
 0x8e6   :  { %v2123_v50 = vsel %vm871_vm4, %v2113_v49, -inf  ;;  %v2112_v51 = vsel %vm5738_vm5, %v2104_v46, -1e+30 }
 0x8e7   :  { %2124 = vmax.xlane.f32.xlu0 %v2123_v50  ;;  %v2120_v44 = vsel %vm871_vm4, %v2112_v51, -inf }
 0x8e8   :  { %2121 = vmax.xlane.f32.xlu1 %v2120_v44 }
 0x955   :  { %v4698_v52 = vpop.f32.mrb[18].mxu1 }
 0x956   :  { %v2107_v56 = vmul.f32 0.35355338, %v4698_v52  ;;  %v1913_v6 = vpop.f32.mrb[19].mxu1 }
 0x957   :  { %v2106_v12 = vmul.f32 0.35355338, %v1913_v6 }
 0x958   :  { %v2115_v11 = vsel %vm5752_vm6, %v2107_v56, -1e+30 }
 0x959   :  { %v4705_v5 = vpop.f32.mrb[14].mxu0  ;;  %v2129_v57 = vsel %vm871_vm4, %v2115_v11, -inf  ;;  %v2114_v59 = vsel %vm5757_vm7, %v2106_v12, -1e+30 }
 0x95a   :  { %v2109_v60 = vmul.f32 0.35355338, %v4705_v5  ;;  %2130 = vmax.xlane.f32.xlu1 %v2129_v57  ;;  %v2004_v58 = vpop.f32.mrb[15].mxu0  ;;  %v2126_v61 = vsel %vm871_vm4, %v2114_v59, -inf }
 0x95b   :  { %v2108_v1 = vmul.f32 0.35355338, %v2004_v58  ;;  %2127 = vmax.xlane.f32.xlu0 %v2126_v61 }
 0x95c   :  { %v2117_v47 = vsel %vm5767_vm8, %v2109_v60, -1e+30 }
 0x95d   :  { %v4712_v3 = vpop.f32.mrb[20].mxu1  ;;  %v2135_v0 = vsel %vm871_vm4, %v2117_v47, -inf  ;;  %v2116_v7 = vsel %vm5772_vm9, %v2108_v1, -1e+30 }
 0x95e   :  { %v2111_v9 = vmul.f32 0.35355338, %v4712_v3  ;;  %v2095_v63 = vpop.f32.mrb[21].mxu1  ;;  %2136 = vmax.xlane.f32.xlu1 %v2135_v0  ;;  %v2132_v10 = vsel %vm871_vm4, %v2116_v7, -inf }
 0x95f   :  { %v2110_v4 = vmul.f32 0.35355338, %v2095_v63  ;;  %2133 = vmax.xlane.f32.xlu0 %v2132_v10 }
 0x960   :  { %v2119_v14 = vsel %vm5781_vm10, %v2111_v9, -1e+30 }
 0x961   :  { %v2141_v15 = vsel %vm871_vm4, %v2119_v14, -inf  ;;  %v2118_v8 = vsel %vm5786_vm11, %v2110_v4, -1e+30 }
 0x962   :  { %2142 = vmax.xlane.f32.xlu1 %v2141_v15  ;;  %v2138_v17 = vsel %vm871_vm4, %v2118_v8, -inf  ;;  %v5211_v15 = vpack.i.bf16 %v5909_v24, %v5911_v22 }
 0x963   :  { %2139 = vmax.xlane.f32.xlu0 %v2138_v17 }
 0x974   :  { %v2125_v19 = vpop.xlane.xlu0 %2124 }
 0x975   :  { %v2145_v54 = vsub.f32 %v2113_v49, %v2125_v19  ;;  %v2122_v21 = vpop.xlane.xlu1 %2121 }
 0x976   :  { %v2144_v23 = vsub.f32 %v2112_v51, %v2122_v21 }
 0x977   :  { %v2154_v32 = vmul.f32 1.442695, %v2145_v54 }
 0x978   :  { %v2152_v34 = vmul.f32 1.442695, %v2144_v23 }
 0x979   :  { %5287 = vpow2.f32 %v2154_v32 }
 0x97a   :  { %5289 = vpow2.f32 %v2152_v34 }
 0x983   :  { %v5288_v35 = vpop.eup %5287 }
 0x984   :  { %v5290_v27 = vpop.eup %5289  ;;  %v2171_v18 = vsel %vm871_vm4, %v5288_v35, 0.0 }
 0x985   :  { %2172 = vadd.xlane.f32.xlu1 %v2171_v18  ;;  %v2168_v36 = vsel %vm871_vm4, %v5290_v27, 0.0 }
 0x986   :  { %2169 = vadd.xlane.f32.xlu0 %v2168_v36 }
 0x9e7   :  { %v2131_v20 = vpop.xlane.xlu1 %2130 }
 0x9e8   :  { %v2147_v39 = vsub.f32 %v2115_v11, %v2131_v20  ;;  %v2128_v41 = vpop.xlane.xlu0 %2127 }
 0x9e9   :  { %v2146_v45 = vsub.f32 %v2114_v59, %v2128_v41 }
 0x9ea   :  { %v2158_v46 = vmul.f32 1.442695, %v2147_v39 }
 0x9eb   :  { %v2156_v49 = vmul.f32 1.442695, %v2146_v45  ;;  %v2137_v50 = vpop.xlane.xlu1 %2136 }
 0x9ec   :  { %5291 = vpow2.f32 %v2158_v46  ;;  %v2149_v51 = vsub.f32 %v2117_v47, %v2137_v50  ;;  %v2134_v44 = vpop.xlane.xlu0 %2133 }
 0x9ed   :  { %5293 = vpow2.f32 %v2156_v49  ;;  %v2148_v52 = vsub.f32 %v2116_v7, %v2134_v44 }
 0x9ee   :  { %v2162_v56 = vmul.f32 1.442695, %v2149_v51 }
 0x9ef   :  { %v2160_v6 = vmul.f32 1.442695, %v2148_v52  ;;  %v2143_v12 = vpop.xlane.xlu1 %2142 }
 0x9f0   :  { %5295 = vpow2.f32 %v2162_v56  ;;  %v2151_v5 = vsub.f32 %v2119_v14, %v2143_v12  ;;  %v2140_v57 = vpop.xlane.xlu0 %2139 }
 0x9f1   :  { %5297 = vpow2.f32 %v2160_v6  ;;  %v2150_v60 = vsub.f32 %v2118_v8, %v2140_v57 }
 0x9f2   :  { %v2166_v58 = vmul.f32 1.442695, %v2151_v5 }
 0x9f3   :  { %v2164_v11 = vmul.f32 1.442695, %v2150_v60 }
 0x9f4   :  { %5299 = vpow2.f32 %v2166_v58 }
 0x9f5   :  { %5301 = vpow2.f32 %v2164_v11 }
 0x9f6   :  { %v5949_v59 = vpop.eup %5291 }
 0x9f7   :  { %v5294_v61 = vpop.eup %5293  ;;  %v2177_v1 = vsel %vm871_vm4, %v5949_v59, 0.0 }
 0x9f8   :  { %2178 = vadd.xlane.f32.xlu1 %v2177_v1  ;;  %v2174_v47 = vsel %vm871_vm4, %v5294_v61, 0.0 }
 0x9f9   :  { %2175 = vadd.xlane.f32.xlu0 %v2174_v47 }
 0x9fa   :  { %v5296_v3 = vpop.eup %5295 }
 0x9fb   :  { %v5298_v0 = vpop.eup %5297  ;;  %v2183_v7 = vsel %vm871_vm4, %v5296_v3, 0.0 }
 0x9fc   :  { %2184 = vadd.xlane.f32.xlu1 %v2183_v7  ;;  %v2180_v9 = vsel %vm871_vm4, %v5298_v0, 0.0 }
 0x9fd   :  { %2181 = vadd.xlane.f32.xlu0 %v2180_v9  ;;  %v2583_v9 = vld [vmem:[#allocation7 + $0xe0] sm:$0xff] }
 0x9fe   :  { %v5956_v63 = vpop.eup %5299 }
 0x9ff   :  { %v5302_v10 = vpop.eup %5301  ;;  %v2189_v4 = vsel %vm871_vm4, %v5956_v63, 0.0 }
 0xa00   :  { %2190 = vadd.xlane.f32.xlu1 %v2189_v4  ;;  %v2186_v14 = vsel %vm871_vm4, %v5302_v10, 0.0  ;;  %v2584_v4 = vld [vmem:[#allocation7 + $0xe8] sm:$0xff] }
 0xa01   :  { %2187 = vadd.xlane.f32.xlu0 %v2186_v14  ;;  %v5046_v14 = vpack.c.bf16 %v2584_v4, %v2583_v9  ;;  %v2718_v9 = vld [vmem:[%s6294_s5 + $0x8] sm:$0xff] }
 0xa11   :  { %5212 = vrot.lane.b32.xlu1 %v5211_v15, %s5493_s20 }
 0xa12   :  { %v2173_v8 = vpop.xlane.xlu1 %2172 }
 0xa13   :  { %5303 = vrcp.f32 %v2173_v8  ;;  %v2170_v17 = vpop.xlane.xlu0 %2169 }
 0xa14   :  { %5305 = vrcp.f32 %v2170_v17 }
 0xa15   :  { %5217 = vrot.lane.b32.xlu1 %v5211_v15, %s5491_s0 }
 0xa17   :  { %5207 = vrot.lane.b32.xlu0 %v5211_v15, %s5492_s2  ;;  %v2586_v15 = vld [vmem:[#allocation7 + $0xf8] sm:$0xff] }
 0xa1d   :  { %v5304_v19 = vpop.eup %5303 }
 0xa1e   :  { %v5306_v54 = vpop.eup %5305  ;;  %v2195_v23 = vmul.f32 %v5304_v19, %v5288_v35 }
 0xa1f   :  { %v2193_v21 = vmul.f32 %v5306_v54, %v5290_v27 }
 0xa21   :  { %4717 = vmatprep.mubr.msk.f32.mxu0 %vm871_vm4, %v2193_v21 }
 0xa22   :  { %4718 = vmatmul.mubr.msk.f32.vlgmr.msra.gmra.mrb[16].mxu0 %vm871_vm4, %v2195_v23 }
 0xa85   :  { %v2179_v32 = vpop.xlane.xlu1 %2178 }
 0xa86   :  { %v2176_v24 = vpop.xlane.xlu0 %2175 }
 0xa87   :  { %5307 = vrcp.f32 %v2176_v24 }
 0xa89   :  { %v2185_v22 = vpop.xlane.xlu1 %2184 }
 0xa8a   :  { %5309 = vrcp.f32 %v2185_v22  ;;  %v2182_v34 = vpop.xlane.xlu0 %2181 }
 0xa8b   :  { %5311 = vrcp.f32 %v2182_v34 }
 0xa8c   :  { %5313 = vrcp.f32 %v2179_v32 }
 0xa8d   :  { %v2191_v18 = vpop.xlane.xlu1 %2190 }
 0xa8e   :  { %v2188_v36 = vpop.xlane.xlu0 %2187 }
 0xa8f   :  { %5315 = vrcp.f32 %v2188_v36 }
 0xa90   :  { %5317 = vrcp.f32 %v2191_v18 }
 0xa91   :  { %v5308_v20 = vpop.eup %5307  ;;  %v5213_v39 = vpop.permute.xlu1 %5212 }
 0xa92   :  { %v5215_v27 = vunpack.i.h.bf16 %v5213_v39  ;;  %v5214_v35 = vunpack.i.l.bf16 %v5213_v39  ;;  %v5208_v41 = vpop.permute.xlu0 %5207  ;;  %v2197_v45 = vmul.f32 %v5308_v20, %v5294_v61 }
 0xa93   :  { %v5210_v46 = vunpack.i.h.bf16 %v5208_v41  ;;  %v5209_v49 = vunpack.i.l.bf16 %v5208_v41 }
 0xa94   :  { %v5310_v50 = vpop.eup %5309  ;;  %v5038_v51 = vpack.c.bf16 %v5215_v27, %v5214_v35  ;;  %4724 = vmatprep.mubr.msk.f32.mxu1 %vm871_vm4, %v2197_v45  ;;  %v2589_v45 = vsub.s32 7, %v5667_v25  ;;  %v5365_v25 = vld [vmem:[%s6290_s1 + $0x8] sm:$0xff] }
 0xa95   :  { %v5312_v44 = vpop.eup %5311  ;;  %v5034_v52 = vpack.c.bf16 %v5210_v46, %v5209_v49  ;;  %v5218_v56 = vpop.permute.xlu1 %5217  ;;  %v2203_v60 = vmul.f32 %v5310_v50, %v5296_v3  ;;  %v5363_v46 = vld [vmem:[#allocation8] sm:$0xff] }
 0xa96   :  { %v5314_v6 = vpop.eup %5313  ;;  %v5220_v12 = vunpack.i.h.bf16 %v5218_v56  ;;  %v5219_v5 = vunpack.i.l.bf16 %v5218_v56  ;;  %5039 = vmatprep.subr.bf16.mxu0 %v5038_v51  ;;  %v2201_v57 = vmul.f32 %v5312_v44, %v5298_v0  ;;  %v2590_v49 = vrot.slane %v5363_v46, %v2589_v45 }
 0xa97   :  { %5035 = vmatprep.subr.bf16.mxu1 %v5034_v52  ;;  %5041 = vmatpush3.bf16.msra.mxu0 %v5038_v51  ;;  %v2199_v61 = vmul.f32 %v5314_v6, %v5949_v59  ;;  %v2585_v59 = vld [vmem:[#allocation7 + $0xf0] sm:$0xff] }
 0xa98   :  { %v5042_v58 = vpack.c.bf16 %v5220_v12, %v5219_v5  ;;  %5037 = vmatpush3.bf16.msra.mxu1 %v5034_v52  ;;  %4731 = vmatprep.mubr.msk.f32.mxu0 %vm871_vm4, %v2201_v57  ;;  %v5050_v8 = vpack.c.bf16 %v2586_v15, %v2585_v59  ;;  %v2814_v57 = vld [vmem:[#allocation7 + $0x120] sm:$0xff] }
 0xa99   :  { %v5316_v11 = vpop.eup %5315  ;;  %5047 = vmatprep.subr.bf16.mxu0 %v5046_v14 }
 0xa9a   :  { %v5318_v1 = vpop.eup %5317  ;;  %4732 = vmatmul.mubr.msk.f32.vlgmr.msra.gmra.mrb[18].mxu0 %vm871_vm4, %v2203_v60  ;;  %5043 = vmatprep.subr.bf16.mxu1 %v5042_v58  ;;  %v2205_v47 = vmul.f32 %v5316_v11, %v5302_v10  ;;  %v2815_v60 = vld [vmem:[#allocation7 + $0x128] sm:$0xff]  ;;  %v5496_v11 = vmov 0.0|0.0  }
 0xa9b   :  { %4725 = vmatmul.mubr.msk.f32.vlgmr.msra.gmra.mrb[22].mxu1 %vm871_vm4, %v2199_v61  ;;  %v2207_v0 = vmul.f32 %v5318_v1, %v5956_v63  ;;  %5049 = vmatpush3.bf16.msra.mxu0 %v5046_v14  ;;  %v5063_v61 = vpack.c.bf16 %v2815_v60, %v2814_v57  ;;  %v2817_v1 = vld [vmem:[#allocation7 + $0x138] sm:$0xff] }
 0xa9c   :  { %5045 = vmatpush3.bf16.msra.mxu1 %v5042_v58  ;;  %4738 = vmatprep.mubr.msk.f32.mxu1 %vm871_vm4, %v2205_v47  ;;  %v2816_v58 = vld [vmem:[#allocation7 + $0x130] sm:$0xff]  ;;  %v5498_v47 = vmov 0.0  }
 0xa9d   :  { %5051 = vmatprep.subr.bf16.mxu0 %v5050_v8 }
 0xa9f   :  { %4739 = vmatmul.mubr.msk.f32.vlgmr.msra.gmra.mrb[24].mxu1 %vm871_vm4, %v2207_v0  ;;  %5053 = vmatpush3.bf16.msra.mxu0 %v5050_v8  ;;  %v2717_v0 = vld [vmem:[%s6294_s5] sm:$0xff] }
 0xaa0   :  { %5062 = vmatprep.subr.bf16.mxu0 %v5496_v11 }
 0xaf5   :  { %v4719_v3 = vpop.f32.mrb[16].mxu0 }
 0xaf6   :  { %v2280_v7 = vpop.f32.mrb[17].mxu0 }
 0xb6d   :  { %v4733_v10 = vpop.f32.mrb[18].mxu0 }
 0xb6e   :  { %v4726_v17 = vpop.f32.mrb[22].mxu1  ;;  %v2456_v19 = vpop.f32.mrb[19].mxu0 }
 0xb6f   :  { %2556 = vrot.lane.b32.xlu1 %v4726_v17, %s5488_s30  ;;  %v2369_v63 = vpop.f32.mrb[23].mxu1 }
 0xb70   :  { %2554 = vrot.lane.b32.xlu0 %v2369_v63, %s5488_s30 }
 0xb72   :  { %v4740_v54 = vpop.f32.mrb[24].mxu1 }
 0xb73   :  { %2564 = vrot.lane.b32.xlu1 %v4733_v10, %s5494_s19  ;;  %v2543_v21 = vpop.f32.mrb[25].mxu1 }
 0xb74   :  { %2562 = vrot.lane.b32.xlu0 %v2456_v19, %s5494_s19 }
 0xb77   :  { %2572 = vrot.lane.b32.xlu1 %v4740_v54, %s5495_s21 }
 0xb78   :  { %2570 = vrot.lane.b32.xlu0 %v2543_v21, %s5495_s21 }
 0xbe1   :  { %v2557_v23 = vpop.permute.xlu1 %2556 }
 0xbe2   :  { %v2555_v32 = vpop.permute.xlu0 %2554  ;;  %v2577_v36 = vsel %vm367_vm1, %v4719_v3, %v2557_v23  ;;  %v6030_v23 = vld [vmem:[%s6293_s4 + $0x10] sm:$0xff] }
 0xbe3   :  { %v2576_v34 = vsel %vm367_vm1, %v2280_v7, %v2555_v32  ;;  %v6013_v7 = vld [vmem:[%s6293_s4 + $0x8] sm:$0xff]  ;;  %v2719_v32 = vld [vmem:[%s6294_s5 + $0x10] sm:$0xff] }
 0xbe4   :  { %v2721_v4 = vadd.f32 %v2718_v9, %v6013_v7 }
 0xbe5   :  { %v2565_v24 = vpop.permute.xlu1 %2564 }
 0xbe6   :  { %v2563_v22 = vpop.permute.xlu0 %2562  ;;  %v2579_v27 = vsel %vm871_vm4, %v2577_v36, %v2565_v24  ;;  %v2722_v24 = vadd.f32 %v2719_v32, %v6030_v23  ;;  %v2726_v36 = vld [vmem:[#allocation7 + $0x110] sm:$0xff] }
 0xbe7   :  { %v2578_v20 = vsel %vm871_vm4, %v2576_v34, %v2563_v22  ;;  %v2724_v22 = vld [vmem:[#allocation7 + $0x100] sm:$0xff]  ;;  %v2725_v34 = vld [vmem:[#allocation7 + $0x108] sm:$0xff] }
 0xbe9   :  { %v2573_v18 = vpop.permute.xlu1 %2572 }
 0xbea   :  { %v2571_v39 = vpop.permute.xlu0 %2570  ;;  %v2581_v41 = vsel %vm1332_vm12, %v2579_v27, %v2573_v18  ;;  %v5054_v18 = vpack.c.bf16 %v2725_v34, %v2724_v22  ;;  %v2821_v27 = vrot.slane %v5858_v29, %v5677_v31 }
 0xbeb   :  { %v2580_v35 = vsel %vm1332_vm12, %v2578_v20, %v2571_v39  ;;  %v2727_v20 = vld [vmem:[#allocation7 + $0x118] sm:$0xff] }
 0xbec   :  { %4749 = vmatprep.mubr.msk.f32.mxu0 %vm111_vm0, %v2580_v35  ;;  %5055 = vmatprep.subr.bf16.mxu1 %v5054_v18  ;;  %v5058_v39 = vpack.c.bf16 %v2727_v20, %v2726_v36 }
 0xbed   :  { %4750 = vmatmul.mubr.msk.f32.vlgmr.msra.gmra.mrb[20].mxu0 %vm111_vm0, %v2581_v41  ;;  %5057 = vmatpush3.bf16.msra.mxu1 %v5054_v18 }
 0xbee   :  { %4771 = vmatprep.mubr.msk.f32.mxu0 %vm5497_vm13, %v5498_v47  ;;  %5064 = vmatpush3.bf16.msra.mxu0 %v5063_v61 }
 0xbef   :  { %5065 = vmatprep.subr.bf16.mxu0 %v5496_v11  ;;  %5059 = vmatprep.subr.bf16.mxu1 %v5058_v39 }
 0xbf1   :  { %5061 = vmatpush3.bf16.msra.mxu1 %v5058_v39 }
 0xbf2   :  { %5068 = vmatprep.subr.bf16.mxu1 %v5496_v11 }
 0xcc0   :  { %v4751_v50 = vpop.f32.mrb[20].mxu0 }
 0xcc1   :  { %v2669_v51 = vadd.f32 %v4751_v50, %v2590_v49  ;;  %v2663_v44 = vpop.f32.mrb[21].mxu0 }
 0xcc2   :  { %v2664_v52 = vadd.f32 %v2663_v44, %v2590_v49 }
 0xcc3   :  { %v2673_v56 = vadd.f32 %v2669_v51, %v5868_v43  ;;  %v6003_v43 = vld [vmem:[%s6293_s4] sm:$0xff] }
 0xcc4   :  { %v2672_v6 = vadd.f32 %v2664_v52, %v5864_v37  ;;  %v5066_v37 = vpack.c.bf16 %v2817_v1, %v2816_v58  ;;  %v2720_v3 = vadd.f32 %v2717_v0, %v6003_v43  ;;  %v2703_v58 = vrot.slane %v5858_v29, %v1661_v53 }
 0xcc5   :  { %v2677_v12 = vsel %vm111_vm0, %v2673_v56, 0.0  ;;  %v2709_v1 = vrot.slane %v5858_v29, %v2589_v45 }
 0xcc6   :  { %2678 = vadd.xlane.f32.xlu1 %v2677_v12  ;;  %v2674_v5 = vsel %vm111_vm0, %v2672_v6, 0.0  ;;  %5067 = vmatpush3.bf16.msra.mxu0 %v5066_v37 }
 0xcc7   :  { %2675 = vadd.xlane.f32.xlu0 %v2674_v5 }
 0xcc9   :  { %4772 = vmatmul.mubr.msk.f32.vlgmr.msra.gmra.mrb[22].mxu0 %vm111_vm0, %v2720_v3 }
 0xcca   :  { %4774 = vmatprep.mubr.msk.f32.mxu0 %vm5497_vm13, %v5498_v47 }
 0xccd   :  { %4775 = vmatmul.mubr.msk.f32.gmra.mrb[24].mxu0 %vm111_vm0, %v2721_v4 }
 0xcce   :  { %4777 = vmatprep.mubr.msk.f32.mxu0 %vm5497_vm13, %v5498_v47 }
 0xcd1   :  { %4778 = vmatmul.mubr.msk.f32.gmra.mrb[26].mxu0 %vm111_vm0, %v2722_v24  ;;  %v2915_v24 = vld [vmem:[#allocation7 + $0x158] sm:$0xff] }
 0xd53   :  { %v2679_v14 = vpop.xlane.xlu1 %2678 }
 0xd54   :  { %v2681_v59 = vmul.f32 0.03125, %v2679_v14  ;;  %v2676_v15 = vpop.xlane.xlu0 %2675 }
 0xd55   :  { %v2680_v8 = vmul.f32 0.03125, %v2676_v15 }
 0xd56   :  { %v2683_v10 = vsub.f32 %v2673_v56, %v2681_v59  ;;  %v5364_v59 = vld [vmem:[%s6290_s1] sm:$0xff] }
 0xd57   :  { %v2682_v17 = vsub.f32 %v2672_v6, %v2680_v8 }
 0xd58   :  { %v2685_v54 = vmul.f32 %v2683_v10, %v2683_v10 }
 0xd59   :  { %v2684_v19 = vmul.f32 %v2682_v17, %v2682_v17 }
 0xd5a   :  { %v2689_v21 = vsel %vm111_vm0, %v2685_v54, 0.0  ;;  %v2914_v54 = vld [vmem:[#allocation7 + $0x150] sm:$0xff] }
 0xd5b   :  { %v2686_v63 = vsel %vm111_vm0, %v2684_v19, 0.0  ;;  %v2912_v19 = vld [vmem:[#allocation7 + $0x140] sm:$0xff]  ;;  %v5072_v18 = vpack.c.bf16 %v2915_v24, %v2914_v54 }
 0xd5c   :  { %2687 = vadd.xlane.f32.xlu0 %v2686_v63  ;;  %v2913_v63 = vld [vmem:[#allocation7 + $0x148] sm:$0xff] }
 0xd5d   :  { %v5069_v32 = vpack.c.bf16 %v2913_v63, %v2912_v19 }
 0xd60   :  { %2690 = vadd.xlane.f32.xlu0 %v2689_v21 }
 0xd9c   :  { %v2897_v35 = vpop.f32.mrb[22].mxu0 }
 0xd9d   :  { %v4773_v41 = vpop.f32.mrb[23].mxu0  ;;  %v2898_v46 = vadd.f32 %v2897_v35, %v2821_v27 }
 0xda0   :  { %v2902_v49 = vpop.f32.mrb[24].mxu0 }
 0xda1   :  { %v2903_v50 = vadd.f32 %v2902_v49, %v2821_v27  ;;  %v4776_v51 = vpop.f32.mrb[25].mxu0 }
 0xda3   :  { %v5221_v44 = vpack.i.bf16 %v2903_v50, %v2898_v46  ;;  %v5074_v52 = vpack.c.bf16 %v2903_v50, %v2898_v46 }
 0xda4   :  { %v2907_v8 = vpop.f32.mrb[26].mxu0 }
 0xda5   :  { %5222 = vrot.lane.b32.xlu1 %v5221_v44, %s5492_s2  ;;  %5076 = vmatprep.subr.msk.bf16.mxu0 %vm5684_vm2, %v5074_v52 }
 0xda6   :  { %5079 = vmatpush3.bf16.xpose.msk.msra.mxu0 %vm5684_vm2, %v5074_v52 }
 0xda9   :  { %5227 = vrot.lane.b32.xlu1 %v5221_v44, %s5493_s20 }
 0xdad   :  { %5232 = vrot.lane.b32.xlu1 %v5221_v44, %s5491_s0 }
 0xde9   :  { %v2688_v56 = vpop.xlane.xlu0 %2687 }
 0xdea   :  { %v2692_v6 = vmul.f32 0.03125, %v2688_v56  ;;  %v2919_v56 = vrot.slane %v5858_v29, %v5703_v42 }
 0xdec   :  { %v2694_v12 = vadd.f32 1e-05, %v2692_v6 }
 0xded   :  { %v2691_v5 = vpop.xlane.xlu0 %2690 }
 0xdee   :  { %5319 = vrsqrt.f32 %v2694_v12  ;;  %v2693_v57 = vmul.f32 0.03125, %v2691_v5 }
 0xdf0   :  { %v2695_v60 = vadd.f32 1e-05, %v2693_v57 }
 0xdf2   :  { %5321 = vrsqrt.f32 %v2695_v60 }
 0xdf8   :  { %v5320_v61 = vpop.eup %5319 }
 0xdf9   :  { %v2698_v37 = vmul.f32 %v5320_v61, %v2682_v17  ;;  %v4779_v17 = vpop.f32.mrb[27].mxu0 }
 0xdfb   :  { %v2704_v0 = vmul.f32 %v2703_v58, %v2698_v37 }
 0xdfc   :  { %v5322_v3 = vpop.eup %5321 }
 0xdfd   :  { %v2699_v9 = vmul.f32 %v5322_v3, %v2683_v10  ;;  %v6053_v4 = vadd.f32 %v2709_v1, %v2704_v0  ;;  %v2908_v10 = vadd.f32 %v2907_v8, %v2821_v27 }
 0xdff   :  { %v2705_v14 = vmul.f32 %v2703_v58, %v2699_v9  ;;  %v2715_v15 = vadd.f32 %v5364_v59, %v6053_v4  ;;  %3107 = vrot.lane.b32.xlu0 %v2908_v10, %s5492_s2  ;;  %4801 = vmatprep.subr.msk.mxu0 %vm367_vm1, %v2908_v10 }
 0xe00   :  { %4802 = vmatpush3.xpose.msk.msra.mxu0 %vm367_vm1, %v2908_v10 }
 0xe01   :  { %4760 = vmatprep.mubr.msk.f32.mxu1 %vm111_vm0, %v2715_v15  ;;  %v6060_v53 = vadd.f32 %v2709_v1, %v2705_v14 }
 0xe03   :  { %v2716_v45 = vadd.f32 %v5365_v25, %v6060_v53 }
 0xe05   :  { %4761 = vmatmul.mubr.msk.f32.vlgmr.msra.gmra.mrb[26].mxu1 %vm111_vm0, %v2716_v45 }
 0xe06   :  { %4788 = vmatprep.mubr.msk.f32.mxu1 %vm5497_vm13, %v5498_v47  ;;  %5070 = vmatpush3.bf16.msra.mxu1 %v5069_v32 }
 0xe07   :  { %5071 = vmatprep.subr.bf16.mxu1 %v5496_v11 }
 0xe0a   :  { %5073 = vmatpush3.bf16.msra.mxu1 %v5072_v18 }
 0xe0d   :  { %4789 = vmatmul.mubr.msk.f32.vlgmr.msra.gmra.mrb[28].mxu1 %vm111_vm0, %v6003_v43 }
 0xe0e   :  { %4791 = vmatprep.mubr.msk.f32.mxu1 %vm5497_vm13, %v5498_v47 }
 0xe11   :  { %4792 = vmatmul.mubr.msk.f32.gmra.mrb[30].mxu1 %vm111_vm0, %v6013_v7 }
 0xe12   :  { %4794 = vmatprep.mubr.msk.f32.mxu1 %vm5497_vm13, %v5498_v47  ;;  %v2731_v47 = vrot.slane %v5858_v29, %v5670_v26 }
 0xe15   :  { %4795 = vmatmul.mubr.msk.f32.gmra.mrb[32].mxu1 %vm111_vm0, %v6030_v23 }
 0xe17   :  { %v5223_v21 = vpop.permute.xlu1 %5222 }
 0xe18   :  { %v5225_v22 = vunpack.i.h.bf16 %v5223_v21  ;;  %v5224_v34 = vunpack.i.l.bf16 %v5223_v21 }
 0xe1a   :  { %v5080_v36 = vpack.c.bf16 %v5225_v22, %v5224_v34 }
 0xe1b   :  { %v5228_v20 = vpop.permute.xlu1 %5227 }
 0xe1c   :  { %v5230_v39 = vunpack.i.h.bf16 %v5228_v20  ;;  %v5229_v27 = vunpack.i.l.bf16 %v5228_v20  ;;  %5082 = vmatprep.subr.msk.bf16.mxu1 %vm5684_vm2, %v5080_v36 }
 0xe1d   :  { %5085 = vmatpush3.bf16.xpose.msk.msra.mxu1 %vm5684_vm2, %v5080_v36 }
 0xe1e   :  { %v5086_v35 = vpack.c.bf16 %v5230_v39, %v5229_v27 }
 0xe1f   :  { %v5233_v11 = vpop.permute.xlu1 %5232 }
 0xe20   :  { %5088 = vmatprep.subr.msk.bf16.mxu0 %vm5684_vm2, %v5086_v35  ;;  %v5235_v41 = vunpack.i.h.bf16 %v5233_v11  ;;  %v5234_v46 = vunpack.i.l.bf16 %v5233_v11 }
 0xe22   :  { %v5092_v49 = vpack.c.bf16 %v5235_v41, %v5234_v46 }
 0xe71   :  { %v3108_v43 = vpop.permute.xlu0 %3107 }
 0xe72   :  { %4810 = vmatprep.subr.msk.mxu1 %vm367_vm1, %v3108_v43 }
 0xe73   :  { %4811 = vmatpush3.xpose.msk.msra.mxu1 %vm367_vm1, %v3108_v43 }
 0xe74   :  { %5094 = vmatprep.subr.msk.bf16.mxu1 %vm5684_vm2, %v5092_v49 }
 0xed8   :  { %v4762_v7 = vpop.f32.mrb[26].mxu1 }
 0xed9   :  { %v2810_v50 = vadd.f32 %v4762_v7, %v2731_v47  ;;  %v2804_v51 = vpop.f32.mrb[27].mxu1 }
 0xeda   :  { %v2805_v44 = vadd.f32 %v2804_v51, %v2731_v47 }
 0xedb   :  { %3101 = vrot.lane.b32.xlu1 %v2810_v50, %s5492_s2 }
 0xedc   :  { %3099 = vrot.lane.b32.xlu0 %v2805_v44, %s5492_s2  ;;  %4803 = vmatprep.mubr.msk.f32.mxu0 %vm367_vm1, %v2805_v44 }
 0xedd   :  { %4804 = vmatmul.mubr.msk.f32.vlgmr.msra.gmra.mrb[28].mxu0 %vm367_vm1, %v2810_v50 }
 0xede   :  { %5091 = vmatpush3.bf16.xpose.msk.msra.mxu0 %vm5684_vm2, %v5086_v35 }
 0xedf   :  { %3297 = vrot.lane.b32.xlu1 %v2908_v10, %s5491_s0 }
 0xee0   :  { %3202 = vrot.lane.b32.xlu0 %v2908_v10, %s5493_s20  ;;  %v2995_v23 = vpop.f32.mrb[28].mxu1 }
 0xee1   :  { %v4790_v52 = vpop.f32.mrb[29].mxu1  ;;  %v6109_v57 = vadd.f32 %v2995_v23, %v2919_v56 }
 0xee3   :  { %3196 = vrot.lane.b32.xlu1 %v2810_v50, %s5493_s20 }
 0xee4   :  { %3194 = vrot.lane.b32.xlu0 %v2805_v44, %s5493_s20  ;;  %v3000_v6 = vpop.f32.mrb[30].mxu1 }
 0xee5   :  { %v4793_v12 = vpop.f32.mrb[31].mxu1  ;;  %v6111_v60 = vadd.f32 %v3000_v6, %v2919_v56 }
 0xee7   :  { %3291 = vrot.lane.b32.xlu1 %v2810_v50, %s5491_s0  ;;  %v5098_v29 = vpack.c.bf16 %v6111_v60, %v6109_v57  ;;  %v5236_v55 = vpack.i.bf16 %v6111_v60, %v6109_v57 }
 0xee8   :  { %3289 = vrot.lane.b32.xlu0 %v2805_v44, %s5491_s0  ;;  %v3005_v58 = vpop.f32.mrb[32].mxu1 }
 0xee9   :  { %v4796_v1 = vpop.f32.mrb[33].mxu1  ;;  %v6122_v14 = vadd.f32 %v3005_v58, %v2919_v56 }
 0xf4d   :  { %v3102_v5 = vpop.permute.xlu1 %3101 }
 0xf4e   :  { %v3100_v61 = vpop.permute.xlu0 %3099 }
 0xf4f   :  { %4812 = vmatprep.mubr.msk.f32.mxu1 %vm367_vm1, %v3100_v61 }
 0xf50   :  { %4813 = vmatmul.mubr.msk.f32.vlgmr.msra.gmra.mrb[34].mxu1 %vm367_vm1, %v3102_v5 }
 0xf51   :  { %5097 = vmatpush3.bf16.xpose.msk.msra.mxu1 %vm5684_vm2, %v5092_v49  ;;  %v3298_v37 = vpop.permute.xlu1 %3297 }
 0xf52   :  { %4828 = vmatprep.subr.msk.mxu1 %vm367_vm1, %v3298_v37  ;;  %v3203_v0 = vpop.permute.xlu0 %3202 }
 0xf53   :  { %4819 = vmatprep.subr.msk.mxu0 %vm367_vm1, %v3203_v0 }
 0xf54   :  { %4820 = vmatpush3.xpose.msk.msra.mxu0 %vm367_vm1, %v3203_v0 }
 0xf55   :  { %v3197_v3 = vpop.permute.xlu1 %3196  ;;  %5099 = vmatprep.subr.bf16.mxu0 %v5098_v29 }
 0xf56   :  { %v3195_v9 = vpop.permute.xlu0 %3194 }
 0xf57   :  { %4821 = vmatprep.mubr.msk.f32.mxu0 %vm367_vm1, %v3195_v9 }
 0xf58   :  { %4822 = vmatmul.mubr.msk.f32.vlgmr.msra.gmra.mrb[30].mxu0 %vm367_vm1, %v3197_v3 }
 0xf59   :  { %4829 = vmatpush3.xpose.msk.msra.mxu1 %vm367_vm1, %v3298_v37  ;;  %5101 = vmatpush3.bf16.msra.mxu0 %v5098_v29  ;;  %v3292_v59 = vpop.permute.xlu1 %3291 }
 0xf5a   :  { %v3290_v40 = vpop.permute.xlu0 %3289  ;;  %4837 = vmatprep.subr.mxu0 %v6122_v14 }
 0xf5b   :  { %4830 = vmatprep.mubr.msk.f32.mxu1 %vm367_vm1, %v3290_v40 }
 0xf5c   :  { %4831 = vmatmul.mubr.msk.f32.vlgmr.msra.gmra.mrb[36].mxu1 %vm367_vm1, %v3292_v59 }
 0xf5d   :  { %4838 = vmatpush3.msra.mxu0 %v6122_v14 }
 0xfb0   :  { %v4805_v15 = vpop.f32.mrb[28].mxu0 }
 0xfb1   :  { %v3385_v25 = vmul.f32 0.35355338, %v4805_v15  ;;  %v3090_v45 = vpop.f32.mrb[29].mxu0 }
 0xfb2   :  { %v3384_v8 = vmul.f32 0.35355338, %v3090_v45 }
 0xfb3   :  { %v3393_v10 = vsel %vm5734_vm3, %v3385_v25, -1e+30 }
 0xfb4   :  { %v3403_v17 = vsel %vm1332_vm12, %v3393_v10, -inf  ;;  %v3392_v19 = vsel %vm5738_vm5, %v3384_v8, -1e+30 }
 0xfb5   :  { %3404 = vmax.xlane.f32.xlu1 %v3403_v17  ;;  %v3400_v63 = vsel %vm1332_vm12, %v3392_v19, -inf }
 0xfb6   :  { %3401 = vmax.xlane.f32.xlu0 %v3400_v63 }
0x1023   :  { %v4814_v54 = vpop.f32.mrb[34].mxu1 }
0x1024   :  { %v3387_v21 = vmul.f32 0.35355338, %v4814_v54  ;;  %v3185_v32 = vpop.f32.mrb[35].mxu1 }
0x1025   :  { %v3386_v24 = vmul.f32 0.35355338, %v3185_v32 }
0x1026   :  { %v3395_v22 = vsel %vm5752_vm6, %v3387_v21, -1e+30 }
0x1027   :  { %v3409_v34 = vsel %vm1332_vm12, %v3395_v22, -inf  ;;  %v3394_v13 = vsel %vm5757_vm7, %v3386_v24, -1e+30 }
0x1028   :  { %3410 = vmax.xlane.f32.xlu0 %v3409_v34  ;;  %v3406_v16 = vsel %vm1332_vm12, %v3394_v13, -inf }
0x102b   :  { %v4823_v18 = vpop.f32.mrb[30].mxu0 }
0x102c   :  { %v3389_v36 = vmul.f32 0.35355338, %v4823_v18  ;;  %3407 = vmax.xlane.f32.xlu0 %v3406_v16  ;;  %v3280_v20 = vpop.f32.mrb[31].mxu0 }
0x102d   :  { %v3388_v39 = vmul.f32 0.35355338, %v3280_v20 }
0x102e   :  { %v3397_v27 = vsel %vm5767_vm8, %v3389_v36, -1e+30 }
0x102f   :  { %v4832_v35 = vpop.f32.mrb[36].mxu1  ;;  %v3415_v33 = vsel %vm1332_vm12, %v3397_v27, -inf  ;;  %v3396_v11 = vsel %vm5772_vm9, %v3388_v39, -1e+30 }
0x1030   :  { %v3391_v41 = vmul.f32 0.35355338, %v4832_v35  ;;  %3416 = vmax.xlane.f32.xlu0 %v3415_v33  ;;  %v3375_v38 = vpop.f32.mrb[37].mxu1  ;;  %v3412_v46 = vsel %vm1332_vm12, %v3396_v11, -inf }
0x1031   :  { %v3390_v49 = vmul.f32 0.35355338, %v3375_v38  ;;  %3413 = vmax.xlane.f32.xlu1 %v3412_v46 }
0x1032   :  { %v3399_v43 = vsel %vm5781_vm10, %v3391_v41, -1e+30 }
0x1033   :  { %v3421_v47 = vsel %vm1332_vm12, %v3399_v43, -inf  ;;  %v3398_v48 = vsel %vm5786_vm11, %v3390_v49, -1e+30 }
0x1034   :  { %3422 = vmax.xlane.f32.xlu0 %v3421_v47  ;;  %v3418_v7 = vsel %vm1332_vm12, %v3398_v48, -inf }
0x1035   :  { %3419 = vmax.xlane.f32.xlu1 %v3418_v7 }
0x1042   :  { %v3405_v62 = vpop.xlane.xlu1 %3404 }
0x1043   :  { %v3425_v50 = vsub.f32 %v3393_v10, %v3405_v62  ;;  %v3402_v51 = vpop.xlane.xlu0 %3401 }
0x1044   :  { %v3424_v44 = vsub.f32 %v3392_v19, %v3402_v51 }
0x1045   :  { %v3434_v2 = vmul.f32 1.442695, %v3425_v50 }
0x1046   :  { %5237 = vrot.lane.b32.xlu1 %v5236_v55, %s5492_s2  ;;  %v3432_v23 = vmul.f32 1.442695, %v3424_v44 }
0x1047   :  { %5323 = vpow2.f32 %v3434_v2 }
0x1048   :  { %5325 = vpow2.f32 %v3432_v23 }
0x104a   :  { %5242 = vrot.lane.b32.xlu0 %v5236_v55, %s5493_s20  ;;  %3576 = vrot.lane.b32.xlu1 %v6122_v14, %s5492_s2 }
0x104e   :  { %5247 = vrot.lane.b32.xlu1 %v5236_v55, %s5491_s0 }
0x1051   :  { %v6162_v52 = vpop.eup %5323 }
0x1052   :  { %v3451_v56 = vsel %vm1332_vm12, %v6162_v52, 0.0  ;;  %v6166_v6 = vpop.eup %5325 }
0x1053   :  { %v3448_v12 = vsel %vm1332_vm12, %v6166_v6, 0.0 }
0x1069   :  { %3452 = vadd.xlane.f32.xlu0 %v3451_v56 }
0x1072   :  { %3449 = vadd.xlane.f32.xlu1 %v3448_v12 }
0x10b5   :  { %v3411_v5 = vpop.xlane.xlu0 %3410 }
0x10b6   :  { %v3427_v57 = vsub.f32 %v3395_v22, %v3411_v5 }
0x10b8   :  { %v3438_v60 = vmul.f32 1.442695, %v3427_v57 }
0x10b9   :  { %v3408_v58 = vpop.xlane.xlu0 %3407 }
0x10ba   :  { %5327 = vpow2.f32 %v3438_v60  ;;  %v3426_v61 = vsub.f32 %v3394_v13, %v3408_v58 }
0x10bc   :  { %v3436_v1 = vmul.f32 1.442695, %v3426_v61 }
0x10bd   :  { %v3417_v37 = vpop.xlane.xlu0 %3416 }
0x10be   :  { %5329 = vpow2.f32 %v3436_v1  ;;  %v3429_v29 = vsub.f32 %v3397_v27, %v3417_v37  ;;  %v3414_v0 = vpop.xlane.xlu1 %3413 }
0x10bf   :  { %v3428_v3 = vsub.f32 %v3396_v11, %v3414_v0 }
0x10c0   :  { %v3442_v9 = vmul.f32 1.442695, %v3429_v29 }
0x10c1   :  { %v3440_v40 = vmul.f32 1.442695, %v3428_v3  ;;  %v3423_v59 = vpop.xlane.xlu0 %3422 }
0x10c2   :  { %5331 = vpow2.f32 %v3442_v9  ;;  %v3431_v15 = vsub.f32 %v3399_v43, %v3423_v59  ;;  %v3420_v25 = vpop.xlane.xlu1 %3419 }
0x10c3   :  { %5333 = vpow2.f32 %v3440_v40  ;;  %v3430_v45 = vsub.f32 %v3398_v48, %v3420_v25  ;;  %v3873_v25 = vld [vmem:[#allocation7 + $0x160] sm:$0xff] }
0x10c4   :  { %v6170_v8 = vpop.eup %5327  ;;  %v3446_v10 = vmul.f32 1.442695, %v3431_v15 }
0x10c5   :  { %v3444_v17 = vmul.f32 1.442695, %v3430_v45  ;;  %v5243_v19 = vpop.permute.xlu0 %5242  ;;  %v3457_v63 = vsel %vm1332_vm12, %v6170_v8, 0.0  ;;  %v3874_v45 = vld [vmem:[#allocation7 + $0x168] sm:$0xff] }
0x10c6   :  { %5335 = vpow2.f32 %v3446_v10  ;;  %v5245_v54 = vunpack.i.h.bf16 %v5243_v19  ;;  %v5244_v21 = vunpack.i.l.bf16 %v5243_v19  ;;  %v5238_v32 = vpop.permute.xlu1 %5237  ;;  %3458 = vadd.xlane.f32.xlu0 %v3457_v63  ;;  %v3875_v10 = vld [vmem:[#allocation7 + $0x170] sm:$0xff] }
0x10c7   :  { %5337 = vpow2.f32 %v3444_v17  ;;  %v5240_v24 = vunpack.i.h.bf16 %v5238_v32  ;;  %v5239_v22 = vunpack.i.l.bf16 %v5238_v32  ;;  %v3876_v17 = vld [vmem:[#allocation7 + $0x178] sm:$0xff] }
0x10c8   :  { %v5330_v34 = vpop.eup %5329  ;;  %v5106_v13 = vpack.c.bf16 %v5245_v54, %v5244_v21  ;;  %v5118_v19 = vpack.c.bf16 %v3876_v17, %v3875_v10 }
0x10c9   :  { %v5102_v18 = vpack.c.bf16 %v5240_v24, %v5239_v22  ;;  %v3454_v16 = vsel %vm1332_vm12, %v5330_v34, 0.0 }
0x10ca   :  { %v3577_v36 = vpop.permute.xlu1 %3576  ;;  %3455 = vadd.xlane.f32.xlu1 %v3454_v16  ;;  %5107 = vmatprep.subr.bf16.mxu0 %v5106_v13 }
0x10cb   :  { %5103 = vmatprep.subr.bf16.mxu1 %v5102_v18 }
0x10cc   :  { %v5332_v20 = vpop.eup %5331  ;;  %5105 = vmatpush3.bf16.msra.mxu1 %v5102_v18 }
0x10cd   :  { %v5334_v39 = vpop.eup %5333  ;;  %4846 = vmatprep.subr.mxu1 %v3577_v36  ;;  %v3463_v27 = vsel %vm1332_vm12, %v5332_v20, 0.0 }
0x10ce   :  { %v5248_v35 = vpop.permute.xlu1 %5247  ;;  %3464 = vadd.xlane.f32.xlu0 %v3463_v27  ;;  %v3460_v33 = vsel %vm1332_vm12, %v5334_v39, 0.0 }
0x10cf   :  { %v5250_v11 = vunpack.i.h.bf16 %v5248_v35  ;;  %v5249_v41 = vunpack.i.l.bf16 %v5248_v35  ;;  %3461 = vadd.xlane.f32.xlu1 %v3460_v33 }
0x10d0   :  { %v5336_v38 = vpop.eup %5335  ;;  %4847 = vmatpush3.msra.mxu1 %v3577_v36 }
0x10d1   :  { %v5338_v46 = vpop.eup %5337  ;;  %v5110_v49 = vpack.c.bf16 %v5250_v11, %v5249_v41  ;;  %v3469_v43 = vsel %vm1332_vm12, %v5336_v38, 0.0 }
0x10d2   :  { %3470 = vadd.xlane.f32.xlu0 %v3469_v43  ;;  %v3466_v47 = vsel %vm1332_vm12, %v5338_v46, 0.0 }
0x10d3   :  { %5111 = vmatprep.subr.bf16.mxu1 %v5110_v49  ;;  %3467 = vadd.xlane.f32.xlu1 %v3466_v47 }
0x10e4   :  { %3756 = vrot.lane.b32.xlu1 %v6122_v14, %s5491_s0 }
0x10e8   :  { %3666 = vrot.lane.b32.xlu0 %v6122_v14, %s5493_s20 }
0x10f6   :  { %v3453_v48 = vpop.xlane.xlu0 %3452 }
0x10f7   :  { %5339 = vrcp.f32 %v3453_v48 }
0x10ff   :  { %v3450_v7 = vpop.xlane.xlu1 %3449 }
0x1100   :  { %5341 = vrcp.f32 %v3450_v7 }
0x1101   :  { %v5340_v55 = vpop.eup %5339 }
0x1102   :  { %v3475_v2 = vmul.f32 %v5340_v55, %v6162_v52 }
0x110a   :  { %v5342_v62 = vpop.eup %5341 }
0x110b   :  { %v3473_v50 = vmul.f32 %v5342_v62, %v6166_v6 }
0x110d   :  { %4839 = vmatprep.mubr.msk.f32.mxu0 %vm1332_vm12, %v3473_v50 }
0x110e   :  { %4840 = vmatmul.mubr.msk.f32.vlgmr.msra.gmra.mrb[32].mxu0 %vm1332_vm12, %v3475_v2 }
0x110f   :  { %5109 = vmatpush3.bf16.msra.mxu0 %v5106_v13 }
0x1153   :  { %v3459_v51 = vpop.xlane.xlu0 %3458 }
0x1154   :  { %5343 = vrcp.f32 %v3459_v51 }
0x1157   :  { %v3456_v44 = vpop.xlane.xlu1 %3455 }
0x1158   :  { %5345 = vrcp.f32 %v3456_v44 }
0x115b   :  { %v3465_v14 = vpop.xlane.xlu0 %3464 }
0x115c   :  { %5347 = vrcp.f32 %v3465_v14  ;;  %v3462_v23 = vpop.xlane.xlu1 %3461 }
0x115d   :  { %5349 = vrcp.f32 %v3462_v23 }
0x115e   :  { %v5344_v5 = vpop.eup %5343 }
0x115f   :  { %v3471_v56 = vpop.xlane.xlu0 %3470  ;;  %v3479_v60 = vmul.f32 %v5344_v5, %v6170_v8  ;;  %v5114_v8 = vpack.c.bf16 %v3874_v45, %v3873_v25 }
0x1160   :  { %5351 = vrcp.f32 %v3471_v56  ;;  %v3468_v12 = vpop.xlane.xlu1 %3467 }
0x1161   :  { %5353 = vrcp.f32 %v3468_v12 }
0x1162   :  { %v5346_v6 = vpop.eup %5345 }
0x1163   :  { %v3667_v52 = vpop.permute.xlu0 %3666  ;;  %v3477_v57 = vmul.f32 %v5346_v6, %v5330_v34 }
0x1164   :  { %4855 = vmatprep.subr.mxu0 %v3667_v52  ;;  %v3757_v1 = vpop.permute.xlu1 %3756 }
0x1165   :  { %4848 = vmatprep.mubr.msk.f32.mxu1 %vm1332_vm12, %v3477_v57  ;;  %4856 = vmatpush3.msra.mxu0 %v3667_v52  ;;  %v4003_v52 = vld [vmem:[%s6297_s8 + $0x8] sm:$0xff] }
0x1166   :  { %v5348_v58 = vpop.eup %5347  ;;  %4849 = vmatmul.mubr.msk.f32.vlgmr.msra.gmra.mrb[38].mxu1 %vm1332_vm12, %v3479_v60  ;;  %5115 = vmatprep.subr.bf16.mxu0 %v5114_v8  ;;  %v4004_v60 = vld [vmem:[%s6297_s8 + $0x10] sm:$0xff] }
0x1167   :  { %v5350_v61 = vpop.eup %5349  ;;  %5113 = vmatpush3.bf16.msra.mxu1 %v5110_v49  ;;  %v3483_v29 = vmul.f32 %v5348_v58, %v5332_v20  ;;  %v4005_v58 = vld [vmem:[%s6297_s8 + $0x18] sm:$0xff] }
0x1168   :  { %4864 = vmatprep.subr.mxu1 %v3757_v1  ;;  %v3481_v37 = vmul.f32 %v5350_v61, %v5334_v39  ;;  %v5126_v61 = vpack.c.bf16 %v4005_v58, %v4004_v60 }
0x116a   :  { %v5352_v0 = vpop.eup %5351  ;;  %4857 = vmatprep.mubr.msk.f32.mxu0 %vm1332_vm12, %v3481_v37  ;;  %v4097_v37 = vld [vmem:[%s6299_s10 + $0x8] sm:$0xff] }
0x116b   :  { %v5354_v3 = vpop.eup %5353  ;;  %4865 = vmatpush3.msra.mxu1 %v3757_v1  ;;  %4858 = vmatmul.mubr.msk.f32.vlgmr.msra.gmra.mrb[34].mxu0 %vm1332_vm12, %v3483_v29  ;;  %v3487_v40 = vmul.f32 %v5352_v0, %v5336_v38  ;;  %v5366_v38 = vld [vmem:[#allocation8 + $0x8] sm:$0xff]  ;;  %v4096_v1 = vld [vmem:[%s6299_s10] sm:$0xff]  ;;  %v4098_v29 = vld [vmem:[%s6299_s10 + $0x10] sm:$0xff] }
0x116c   :  { %v3485_v9 = vmul.f32 %v5354_v3, %v5338_v46  ;;  %5117 = vmatpush3.bf16.msra.mxu0 %v5114_v8  ;;  %v3880_v46 = vrot.slane %v5366_v38, %v5840_v30  ;;  %v5130_v0 = vpack.c.bf16 %v4097_v37, %v4096_v1  ;;  %v4099_v3 = vld [vmem:[%s6299_s10 + $0x18] sm:$0xff] }
0x116d   :  { %5119 = vmatprep.subr.bf16.mxu0 %v5118_v19 }
0x116e   :  { %4866 = vmatprep.mubr.msk.f32.mxu1 %vm1332_vm12, %v3485_v9  ;;  %v5134_v9 = vpack.c.bf16 %v4099_v3, %v4098_v29 }
0x116f   :  { %4867 = vmatmul.mubr.msk.f32.vlgmr.msra.gmra.mrb[40].mxu1 %vm1332_vm12, %v3487_v40  ;;  %v4100_v40 = vld [vmem:[%s6299_s10 + $0x20] sm:$0xff] }
0x1170   :  { %5121 = vmatpush3.bf16.msra.mxu0 %v5118_v19 }
0x1171   :  { %5131 = vmatprep.subr.bf16.mxu0 %v5130_v0 }
0x11e1   :  { %v4841_v59 = vpop.f32.mrb[32].mxu0 }
0x11e2   :  { %v3560_v15 = vpop.f32.mrb[33].mxu0 }
0x1239   :  { %v4850_v63 = vpop.f32.mrb[38].mxu1 }
0x123a   :  { %3846 = vrot.lane.b32.xlu1 %v4850_v63, %s5488_s30  ;;  %v3653_v54 = vpop.f32.mrb[39].mxu1  ;;  %v6245_v63 = vld [vmem:[#allocation8 + $0x10] sm:$0x1f] }
0x123b   :  { %3844 = vrot.lane.b32.xlu0 %v3653_v54, %s5488_s30  ;;  %v3993_v54 = vrot.slane %v6245_v63, %v5670_v26  ;;  %v4103_v26 = vld [vmem:[%s6299_s10 + $0x38] sm:$0xff] }
0x123e   :  { %v4859_v21 = vpop.f32.mrb[34].mxu0 }
0x123f   :  { %3854 = vrot.lane.b32.xlu1 %v4859_v21, %s5494_s19  ;;  %v3743_v32 = vpop.f32.mrb[35].mxu0 }
0x1240   :  { %3852 = vrot.lane.b32.xlu0 %v3743_v32, %s5494_s19 }
0x1242   :  { %v4868_v24 = vpop.f32.mrb[40].mxu1 }
0x1243   :  { %v3833_v22 = vpop.f32.mrb[41].mxu1  ;;  %3862 = vrot.lane.b32.xlu1 %v4868_v24, %s5495_s21  ;;  %v3999_v24 = vrot.slane %v6245_v63, %v5677_v31  ;;  %v4353_v31 = vld [vmem:[%s6298_s9] ss:$0 sm:$0xff]  ;;  %s5499_s9 = smov [#allocation10]  }
0x1244   :  { %3860 = vrot.lane.b32.xlu0 %v3833_v22, %s5495_s21 }
0x12ac   :  { %v3847_v34 = vpop.permute.xlu1 %3846 }
0x12ad   :  { %v3845_v13 = vpop.permute.xlu0 %3844  ;;  %v3867_v39 = vsel %vm367_vm1, %v4841_v59, %v3847_v34  ;;  %v4101_v59 = vld [vmem:[%s6299_s10 + $0x28] sm:$0xff] }
0x12ae   :  { %v3866_v36 = vsel %vm367_vm1, %v3560_v15, %v3845_v13  ;;  %v5138_v15 = vpack.c.bf16 %v4101_v59, %v4100_v40 }
0x12b1   :  { %v3855_v18 = vpop.permute.xlu1 %3854 }
0x12b2   :  { %v3853_v16 = vpop.permute.xlu0 %3852  ;;  %v3869_v33 = vsel %vm871_vm4, %v3867_v39, %v3855_v18 }
0x12b3   :  { %v3868_v27 = vsel %vm871_vm4, %v3866_v36, %v3853_v16 }
0x12b5   :  { %v3863_v20 = vpop.permute.xlu1 %3862 }
0x12b6   :  { %v3861_v35 = vpop.permute.xlu0 %3860  ;;  %v3871_v41 = vsel %vm1332_vm12, %v3869_v33, %v3863_v20  ;;  %v4102_v20 = vld [vmem:[%s6299_s10 + $0x30] sm:$0xff]  ;;  %s4237_s10 = sshll.u32 %s5499_s9, 4  ;;  %s4238_s10 = int_to_ptr.vmem [resolvable:$true] %s4237_s10 }
0x12b7   :  { %v3870_v11 = vsel %vm1332_vm12, %v3868_v27, %v3861_v35  ;;  %v5142_v39 = vpack.c.bf16 %v4103_v26, %v4102_v20  ;;  %s5455_s1 = scalar_lea.vmem %s4238_s10, 256  ;;  %p5460_p5 = scmp.lt.s32.totalorder %s4238_s10, %s4238_s10 }
0x12b8   :  { %4877 = vmatprep.mubr.msk.f32.mxu0 %vm111_vm0, %v3870_v11  ;;  %p5456_p4 = scmp.ne.s32.totalorder %s4238_s10, %s5455_s1  ;;  %p5461_p6 = scmp.lt.s32.totalorder %s5455_s1, %s5455_s1 }
0x12b9   :  { %4878 = vmatmul.mubr.msk.f32.vlgmr.msra.gmra.mrb[36].mxu0 %vm111_vm0, %v3871_v41 }
0x12ba   :  { %5133 = vmatpush3.bf16.msra.mxu0 %v5130_v0  ;;  %v4227_v0 = vrot.slane %v6245_v63, %v5840_v30  ;;  %p5462_p7 = por %p5461_p6, %p5460_p5 }
0x12bb   :  { %5135 = vmatprep.subr.bf16.mxu0 %v5134_v9 }
0x12bc   :  { %p5463_p8 = pnand %p5462_p7, %p5456_p4 }
0x12be   :  { %5137 = vmatpush3.bf16.msra.mxu0 %v5134_v9 }
0x12bf   :  { %5139 = vmatprep.subr.bf16.mxu0 %v5138_v15 }
0x12c2   :  { %5141 = vmatpush3.bf16.msra.mxu0 %v5138_v15 }
0x12c3   :  { %5143 = vmatprep.subr.bf16.mxu0 %v5142_v39 }
0x12c6   :  { %5145 = vmatpush3.bf16.msra.mxu0 %v5142_v39 }
0x138c   :  { %v4879_v49 = vpop.f32.mrb[36].mxu0 }
0x138d   :  { %v3959_v43 = vadd.f32 %v4879_v49, %v3880_v46  ;;  %v3953_v47 = vpop.f32.mrb[37].mxu0 }
0x138e   :  { %v3954_v48 = vadd.f32 %v3953_v47, %v3880_v46  ;;  %v4107_v46 = vrot.slane %v6245_v63, %v5856_v28 }
0x138f   :  { %v3963_v7 = vadd.f32 %v3959_v43, %v6060_v53 }
0x1390   :  { %v3962_v55 = vadd.f32 %v3954_v48, %v6053_v4  ;;  %v4002_v4 = vld [vmem:[%s6297_s8] sm:$0xff] }
0x1391   :  { %v3967_v62 = vsel %vm111_vm0, %v3963_v7, 0.0  ;;  %v5122_v57 = vpack.c.bf16 %v4003_v52, %v4002_v4 }
0x1392   :  { %3968 = vadd.xlane.f32.xlu1 %v3967_v62  ;;  %v3964_v50 = vsel %vm111_vm0, %v3962_v55, 0.0 }
0x1393   :  { %3965 = vadd.xlane.f32.xlu0 %v3964_v50  ;;  %5123 = vmatprep.subr.bf16.mxu1 %v5122_v57 }
0x1394   :  { %5125 = vmatpush3.bf16.msra.mxu1 %v5122_v57 }
0x1395   :  { %5127 = vmatprep.subr.bf16.mxu1 %v5126_v61 }
0x1398   :  { %5129 = vmatpush3.bf16.msra.mxu1 %v5126_v61  ;;  %v4221_v61 = vrot.slane %v6245_v63, %v5703_v42 }
0x141f   :  { %v3969_v2 = vpop.xlane.xlu1 %3968 }
0x1420   :  { %v3971_v51 = vmul.f32 0.03125, %v3969_v2  ;;  %v3966_v44 = vpop.xlane.xlu0 %3965 }
0x1421   :  { %v3970_v14 = vmul.f32 0.03125, %v3966_v44 }
0x1422   :  { %v3973_v23 = vsub.f32 %v3963_v7, %v3971_v51 }
0x1423   :  { %v3972_v56 = vsub.f32 %v3962_v55, %v3970_v14 }
0x1424   :  { %v3975_v6 = vmul.f32 %v3973_v23, %v3973_v23 }
0x1425   :  { %v3974_v12 = vmul.f32 %v3972_v56, %v3972_v56 }
0x1426   :  { %v3979_v53 = vsel %vm111_vm0, %v3975_v6, 0.0 }
0x1427   :  { %v3976_v5 = vsel %vm111_vm0, %v3974_v12, 0.0 }
0x1428   :  { %3977 = vadd.xlane.f32.xlu0 %v3976_v5 }
0x142c   :  { %3980 = vadd.xlane.f32.xlu0 %v3979_v53 }
0x14b5   :  { %v3978_v25 = vpop.xlane.xlu0 %3977 }
0x14b6   :  { %v3982_v45 = vmul.f32 0.03125, %v3978_v25 }
0x14b8   :  { %v3984_v8 = vadd.f32 1e-05, %v3982_v45 }
0x14b9   :  { %v3981_v10 = vpop.xlane.xlu0 %3980 }
0x14ba   :  { %5355 = vrsqrt.f32 %v3984_v8  ;;  %v3983_v17 = vmul.f32 0.03125, %v3981_v10 }
0x14bc   :  { %v3985_v19 = vadd.f32 1e-05, %v3983_v17 }
0x14be   :  { %5357 = vrsqrt.f32 %v3985_v19 }
0x14c4   :  { %v5356_v21 = vpop.eup %5355 }
0x14c5   :  { %v3988_v32 = vmul.f32 %v5356_v21, %v3972_v56 }
0x14c7   :  { %v3994_v22 = vmul.f32 %v3993_v54, %v3988_v32 }
0x14c8   :  { %v5358_v34 = vpop.eup %5357 }
0x14c9   :  { %v3989_v13 = vmul.f32 %v5358_v34, %v3973_v23  ;;  %v4000_v18 = vadd.f32 %v3999_v24, %v3994_v22 }
0x14cb   :  { %v3995_v16 = vmul.f32 %v3993_v54, %v3989_v13  ;;  %4888 = vmatprep.mubr.msk.f32.mxu1 %vm111_vm0, %v4000_v18 }
0x14cd   :  { %v4001_v36 = vadd.f32 %v3999_v24, %v3995_v16 }
0x14cf   :  { %4889 = vmatmul.mubr.msk.f32.vlgmr.msra.gmra.mrb[42].mxu1 %vm111_vm0, %v4001_v36 }
0x15a2   :  { %v4890_v27 = vpop.f32.mrb[42].mxu1 }
0x15a3   :  { %v4091_v35 = vadd.f32 %v4890_v27, %v4353_v31  ;;  %v4085_v33 = vpop.f32.mrb[43].mxu1 }
0x15a4   :  { %v4086_v11 = vadd.f32 %v4353_v31, %v4085_v33 }
0x15a5   :  { %v4095_v38 = vmax.f32 %v4091_v35, 0.0 }
0x15a6   :  { %v4094_v41 = vmax.f32 %v4086_v11, 0.0 }
0x15a8   :  { %4907 = vmatprep.mubr.msk.f32.mxu0 %vm4108_vm14, %v4094_v41 }
0x15a9   :  { %4908 = vmatmul.mubr.msk.f32.vlgmr.msra.gmra.mrb[38].mxu0 %vm4108_vm14, %v4095_v38 }
0x167c   :  { %v4909_v49 = vpop.f32.mrb[38].mxu0 }
0x167d   :  { %v4187_v43 = vadd.f32 %v4909_v49, %v4107_v46  ;;  %v4181_v47 = vpop.f32.mrb[39].mxu0 }
0x167e   :  { %v4182_v48 = vadd.f32 %v4181_v47, %v4107_v46 }
0x167f   :  { %v4191_v7 = vadd.f32 %v4187_v43, %v4001_v36 }
0x1680   :  { %v4190_v55 = vadd.f32 %v4182_v48, %v4000_v18 }
0x1681   :  { %v4195_v62 = vsel %vm111_vm0, %v4191_v7, 0.0 }
0x1682   :  { %4196 = vadd.xlane.f32.xlu0 %v4195_v62  ;;  %v4192_v50 = vsel %vm111_vm0, %v4190_v55, 0.0 }
0x1683   :  { %4193 = vadd.xlane.f32.xlu1 %v4192_v50 }
0x170f   :  { %v4197_v2 = vpop.xlane.xlu0 %4196 }
0x1710   :  { %v4199_v51 = vmul.f32 0.03125, %v4197_v2  ;;  %v4194_v44 = vpop.xlane.xlu1 %4193 }
0x1711   :  { %v4198_v14 = vmul.f32 0.03125, %v4194_v44 }
0x1712   :  { %v4201_v23 = vsub.f32 %v4191_v7, %v4199_v51 }
0x1713   :  { %v4200_v56 = vsub.f32 %v4190_v55, %v4198_v14 }
0x1714   :  { %v4203_v12 = vmul.f32 %v4201_v23, %v4201_v23 }
0x1715   :  { %v4202_v28 = vmul.f32 %v4200_v56, %v4200_v56 }
0x1716   :  { %v4207_v5 = vsel %vm111_vm0, %v4203_v12, 0.0 }
0x1717   :  { %4208 = vadd.xlane.f32.xlu0 %v4207_v5  ;;  %v4204_v6 = vsel %vm111_vm0, %v4202_v28, 0.0 }
0x1718   :  { %4205 = vadd.xlane.f32.xlu1 %v4204_v6 }
0x17a4   :  { %v4209_v53 = vpop.xlane.xlu0 %4208 }
0x17a5   :  { %v4211_v4 = vmul.f32 0.03125, %v4209_v53  ;;  %v4206_v52 = vpop.xlane.xlu1 %4205 }
0x17a6   :  { %v4210_v57 = vmul.f32 0.03125, %v4206_v52 }
0x17a7   :  { %v4213_v60 = vadd.f32 1e-05, %v4211_v4 }
0x17a8   :  { %v4212_v58 = vadd.f32 1e-05, %v4210_v57 }
0x17a9   :  { %5359 = vrsqrt.f32 %v4213_v60 }
0x17aa   :  { %5361 = vrsqrt.f32 %v4212_v58 }
0x17b3   :  { %v5360_v1 = vpop.eup %5359 }
0x17b4   :  { %v5362_v37 = vpop.eup %5361  ;;  %v4217_v29 = vmul.f32 %v5360_v1, %v4201_v23 }
0x17b5   :  { %v4216_v3 = vmul.f32 %v5362_v37, %v4200_v56 }
0x17b6   :  { %v4223_v9 = vmul.f32 %v4221_v61, %v4217_v29 }
0x17b7   :  { %v4222_v40 = vmul.f32 %v4221_v61, %v4216_v3 }
0x17b8   :  { %v4229_v59 = vadd.f32 %v4227_v0, %v4223_v9 }
0x17b9   :  { %v4228_v15 = vadd.f32 %v4227_v0, %v4222_v40 }
0x17ba   :  { %4231 = vst.msk [vmem:[#allocation10 + $0x8] sm:$0xff] %vm111_vm0, %v4229_v59 }
0x17bb   :  { %4230 = vst.msk [vmem:[#allocation10] sm:$0xff] %vm111_vm0, %v4228_v15 }
0x17bc   :  { %5466 = shalt.err (!%p5463_p8)
}
0x17bd   :  { %s5467_s17 = scalar_lea.hbm %s6300_s11, 256 }
0x17be   :  { %p5468_p9 = scmp.ne.s32.totalorder %s6300_s11, %s5467_s17  ;;  %p5471_p10 = scmp.lt.u32.totalorder %s5467_s17, %s6300_s11 }
0x17c0   :  { %p5473_p11 = pnand %p5471_p10, %p5468_p9 }
0x17c2   :  { %5476 = shalt.err (!%p5473_p11)
}
0x17c3   :  { %4243 = dma.vmem_to_hbm [thread:$0]  %s4238_s10, 256, %s6300_s11, [#allocation4], %s5487_s29, %s5487_s29, %s5488_s30  }
0x17c4   :  { %5483 = dma.done.wait [#allocation4], 256  }
0x17c5   :  { %5484 = vsyncadd [#allocation4], 4294967040 }
0x17c6   :  { %4247 = vsyncpa [#allocation3], 1 }
0x17c7   :  { %4248 = vsyncpa [#allocation6], 1 }
0x17c8   :  { %4249 = vsyncpa [#allocation9], 1 }
0x17c9   :  { %4250 = vsyncpa [#allocation4], 1 }

</bundles_post_ra>
